<compile_context>
chip_gen: v7x
topology: tpu7x:2x2x1
jax: 0.10.0
libtpu: 0.0.40
codegen_flags: <defaults>
</compile_context>

<pallas_src>
import functools

import jax
import jax.numpy as jnp
from jax.experimental import pallas as pl
from jax.experimental.pallas import tpu as pltpu

EPS = 1e-5
OUT_PAD = 128  # lane-dense output width (true output dim = 3, sliced in the wrapper)


def _derive_vmem_limit_bytes():
    """Scoped-VMEM limit sized to the chip generation with compiler headroom."""
    try:
        info = pltpu.get_tpu_info()
        cap = int(getattr(info, "vmem_capacity_bytes", 64 * 1024 * 1024))
    except Exception:  # conservative fallback: assume v7x-sized (64 MiB) VMEM
        cap = 64 * 1024 * 1024
    # ~3/4 of physical (v7x: 48 MiB, v5e/v6e: 96 MiB), capped at 100 MiB.
    return min((cap * 3) // 4, 100 * 1024 * 1024)


_VMEM_LIMIT_BYTES = _derive_vmem_limit_bytes()


def _mxu(a_bf16, b_bf16):
    """MXU matmul: bf16 operands (already cast), f32 accumulation."""
    return jnp.dot(a_bf16, b_bf16, preferred_element_type=jnp.float32)


def _bn_relu_bf16(x, gamma, beta):
    """Training-mode BatchNorm1d fused with ReLU, emitting bf16 matmul operands.

    Single-pass stats over rows (== batch*length) per channel column, biased
    variance (PyTorch train mode), folded into one x*scale+shift FMA.  Stats and
    the FMA stay f32; only the ReLU output is cast (it feeds an MXU matmul).
    """
    inv_n = 1.0 / x.shape[0]
    mean = jnp.sum(x, axis=0, keepdims=True) * inv_n
    var = jnp.sum(x * x, axis=0, keepdims=True) * inv_n - mean * mean
    var = jnp.maximum(var, 0.0)                     # cancellation safety
    scale = gamma * jax.lax.rsqrt(var + EPS)
    shift = beta - mean * scale
    return jnp.maximum(x * scale + shift, 0.0).astype(jnp.bfloat16)


def texture_field_kernel(
    p_ref, zc_ref,
    fcp_w_ref, fcp_b_ref,
    fczc_w_ref, fczc_b_ref,
    bn0_g_ref, bn0_b_ref, bn1_g_ref, bn1_b_ref,
    fc0_w_ref, fc1_w_ref, fc1_b_ref,
    fcout_w_ref, fcout_b_ref,
    out_ref,
    *, n_blocks, batch, points,
):
    B, T = batch, points
    H = fc0_w_ref.shape[-1]
    N = B * T

    # --- fc_p on the MXU (K=3 bf16 matmul; the MXU slot has large slack here),
    #     f32 accumulation + f32 bias.
    net = _mxu(p_ref[...], fcp_w_ref[...]) + fcp_b_ref[...]           # (N, H) f32

    # --- All 2*n_blocks z/c projections as ONE matmul:
    #     zc (B, Zd+Cd) @ W (Zd+Cd, n_blocks*H) + fused bias.
    zc_all = _mxu(zc_ref[...], fczc_w_ref[...]) + fczc_b_ref[...]     # (B, n_blocks*H) f32

    for n in range(n_blocks):                       # static unroll (n_blocks=5)
        zc_n = zc_all[:, n * H:(n + 1) * H]                            # (B, H)
        net = (net.reshape(B, T, H) + zc_n[:, None, :]).reshape(N, H)

        # ResnetBlockConv1d (identity shortcut since size_in == size_out).
        h = _bn_relu_bf16(net, bn0_g_ref[n], bn0_b_ref[n])
        # fc_0 bias omitted: a per-channel constant directly before training-mode
        # BN (bn_1) cancels exactly in the normalized output.
        h = _mxu(h, fc0_w_ref[n])                                      # conv1d k=1
        h = _bn_relu_bf16(h, bn1_g_ref[n], bn1_b_ref[n])
        net = net + _mxu(h, fc1_w_ref[n]) + fc1_b_ref[n]

    # --- fc_out, zero-padded to 128 output lanes → unmasked lane-dense bf16 store.
    out = _mxu(jnp.maximum(net, 0.0).astype(jnp.bfloat16), fcout_w_ref[...])
    out = jax.nn.sigmoid(out + fcout_b_ref[...])
    out_ref[...] = out.astype(out_ref.dtype)


@jax.jit
def texture_field_forward(p, z, c, params):
    B, T, D = p.shape
    n_blocks, _, H = params["fc0_w"].shape
    N = B * T

    bf16 = lambda w: w.astype(jnp.bfloat16)

    # Parameter prep (pure layout work, fused by XLA outside the kernel):
    #  * concat per-block fc_z / fc_c into one (Zd+Cd, n_blocks*H) weight + bias.
    #  * zero-pad fc_out to 128 output lanes.
    #  * all matmul operands (inputs + weights) pre-cast to bf16; f32 accumulation
    #    and f32 biases/stats inside the kernel.
    zc = jnp.concatenate([z, c], axis=-1)                                  # (B, Zd+Cd)
    fczc_w = jnp.concatenate([params["fcz_w"], params["fcc_w"]], axis=1)   # (n, Zd+Cd, H)
    fczc_w = jnp.transpose(fczc_w, (1, 0, 2)).reshape(-1, n_blocks * H)
    fczc_b = (params["fcz_b"] + params["fcc_b"]).reshape(1, n_blocks * H)
    fcout_w = jnp.zeros((H, OUT_PAD), jnp.float32).at[:, :3].set(params["fcout_w"])
    fcout_b = jnp.zeros((1, OUT_PAD), jnp.float32).at[:, :3].set(params["fcout_b"])

    args = (
        bf16(p.reshape(N, D)), bf16(zc),
        bf16(params["fcp_w"]), params["fcp_b"],
        bf16(fczc_w), fczc_b,
        params["bn0_g"], params["bn0_b"], params["bn1_g"], params["bn1_b"],
        bf16(params["fc0_w"]),
        bf16(params["fc1_w"]), params["fc1_b"],
        bf16(fcout_w), fcout_b,
    )
    vmem = pl.BlockSpec(memory_space=pltpu.MemorySpace.VMEM)
    # Single-invocation kernel: training-mode BatchNorm couples every (batch, point)
    # row, so the whole (B*T, H) slab lives in VMEM at these small sizes.
    out = pl.pallas_call(
        functools.partial(texture_field_kernel, n_blocks=n_blocks, batch=B, points=T),
        out_shape=jax.ShapeDtypeStruct((N, OUT_PAD), jnp.bfloat16),
        in_specs=[vmem] * len(args),
        out_specs=vmem,
        compiler_params=pltpu.CompilerParams(vmem_limit_bytes=_VMEM_LIMIT_BYTES),
    )(*args)
    return out[:, :3].reshape(B, T, 3).astype(jnp.float32)


@jax.jit
def reference_forward(p, z, c, params):
    """Pure-JAX mirror of the PyTorch forward (same bf16-operand matmul numerics)."""
    B, T, D = p.shape
    H = params["fcp_w"].shape[1]
    n_blocks = params["fc0_w"].shape[0]
    N = B * T

    def dot(a, b):
        return jnp.dot(a.astype(jnp.bfloat16), b.astype(jnp.bfloat16),
                       preferred_element_type=jnp.float32)

    def bn(x, gamma, beta):
        mean = jnp.mean(x, axis=0, keepdims=True)
        var = jnp.mean((x - mean) ** 2, axis=0, keepdims=True)  # biased, train mode
        return (x - mean) * jax.lax.rsqrt(var + EPS) * gamma + beta

    net = dot(p.reshape(N, D), params["fcp_w"]) + params["fcp_b"]
    for n in range(n_blocks):
        net_z = dot(z, params["fcz_w"][n]) + params["fcz_b"][n]
        net_c = dot(c, params["fcc_w"][n]) + params["fcc_b"][n]
        net = (net.reshape(B, T, H) + net_z[:, None, :] + net_c[:, None, :]).reshape(N, H)
        h = jnp.maximum(bn(net, params["bn0_g"][n], params["bn0_b"][n]), 0.0)
        h = dot(h, params["fc0_w"][n]) + params["fc0_b"][n]   # fc_0 bias kept (cancels in bn_1)
        h = jnp.maximum(bn(h, params["bn1_g"][n], params["bn1_b"][n]), 0.0)
        net = net + dot(h, params["fc1_w"][n]) + params["fc1_b"][n]
    out = dot(jnp.maximum(net, 0.0), params["fcout_w"]) + params["fcout_b"]
    return jax.nn.sigmoid(out).reshape(B, T, 3)


def init_params(key, *, dim=3, z_dim=32, c_dim=32, hidden=128, n_blocks=5):
    # Synthetic, deterministic parameters.  (PyTorch zero-inits fc_1.weight in the
    # resnet block; random weights are used instead so the full dataflow is
    # exercised — forward *semantics* are identical.)
    keys = iter(jax.random.split(key, 32))

    def rnd(shape, scale):
        return jax.random.normal(next(keys), shape, jnp.float32) * scale

    return dict(
        fcp_w=rnd((dim, hidden), dim ** -0.5),
        fcp_b=rnd((1, hidden), 0.1),
        fcz_w=rnd((n_blocks, z_dim, hidden), z_dim ** -0.5),
        fcz_b=rnd((n_blocks, 1, hidden), 0.1),
        fcc_w=rnd((n_blocks, c_dim, hidden), c_dim ** -0.5),
        fcc_b=rnd((n_blocks, 1, hidden), 0.1),
        bn0_g=1.0 + rnd((n_blocks, 1, hidden), 0.1),
        bn0_b=rnd((n_blocks, 1, hidden), 0.1),
        bn1_g=1.0 + rnd((n_blocks, 1, hidden), 0.1),
        bn1_b=rnd((n_blocks, 1, hidden), 0.1),
        fc0_w=rnd((n_blocks, hidden, hidden), hidden ** -0.5),
        fc0_b=rnd((n_blocks, 1, hidden), 0.1),
        fc1_w=rnd((n_blocks, hidden, hidden), hidden ** -0.5),
        fc1_b=rnd((n_blocks, 1, hidden), 0.1),
        fcout_w=rnd((hidden, 3), hidden ** -0.5),
        fcout_b=rnd((1, 3), 0.1),
    )


if __name__ == "__main__":
    B, T, DIM, Z_DIM, C_DIM, HIDDEN, N_BLOCKS = 2, 16, 3, 32, 32, 128, 5

    key = jax.random.PRNGKey(0)
    kp, kz, kc, kparams = jax.random.split(key, 4)
    p = jax.random.normal(kp, (B, T, DIM), jnp.float32)
    z = jax.random.normal(kz, (B, Z_DIM), jnp.float32)
    c = jax.random.normal(kc, (B, C_DIM), jnp.float32)
    params = init_params(kparams, dim=DIM, z_dim=Z_DIM, c_dim=C_DIM,
                         hidden=HIDDEN, n_blocks=N_BLOCKS)

    out = jax.block_until_ready(texture_field_forward(p, z, c, params))
    ref = jax.block_until_ready(reference_forward(p, z, c, params))

    assert out.shape == (B, T, 3), out.shape
    max_err = float(jnp.max(jnp.abs(out - ref)))
    assert jnp.allclose(out, ref, atol=1e-2, rtol=1e-2), max_err

    print("KERNEL_OK")
</pallas_src>

<mosaic_0001>
module attributes {stable_mosaic.version = 11 : i64} {
  func.func @texture_field_kernel(%arg0: memref<32x3xbf16, #tpu.memory_space<vmem>>, %arg1: memref<2x64xbf16, #tpu.memory_space<vmem>>, %arg2: memref<3x128xbf16, #tpu.memory_space<vmem>>, %arg3: memref<1x128xf32, #tpu.memory_space<vmem>>, %arg4: memref<64x640xbf16, #tpu.memory_space<vmem>>, %arg5: memref<1x640xf32, #tpu.memory_space<vmem>>, %arg6: memref<5x1x128xf32, #tpu.memory_space<vmem>>, %arg7: memref<5x1x128xf32, #tpu.memory_space<vmem>>, %arg8: memref<5x1x128xf32, #tpu.memory_space<vmem>>, %arg9: memref<5x1x128xf32, #tpu.memory_space<vmem>>, %arg10: memref<5x128x128xbf16, #tpu.memory_space<vmem>>, %arg11: memref<5x128x128xbf16, #tpu.memory_space<vmem>>, %arg12: memref<5x1x128xf32, #tpu.memory_space<vmem>>, %arg13: memref<128x128xbf16, #tpu.memory_space<vmem>>, %arg14: memref<1x128xf32, #tpu.memory_space<vmem>>, %arg15: memref<32x128xbf16, #tpu.memory_space<vmem>>) attributes {dimension_semantics = [], scalar_prefetch = 0 : i64, scratch_operands = 0 : i64, tpu.core_type = #tpu.core_type<tc>} {
    %c0 = arith.constant 0 : index
    %c0_0 = arith.constant 0 : index
    %0 = vector.load %arg0[%c0, %c0_0] : memref<32x3xbf16, #tpu.memory_space<vmem>>, vector<32x3xbf16>
    %c0_1 = arith.constant 0 : index
    %c0_2 = arith.constant 0 : index
    %1 = vector.load %arg2[%c0_1, %c0_2] : memref<3x128xbf16, #tpu.memory_space<vmem>>, vector<3x128xbf16>
    %cst = arith.constant dense<0.000000e+00> : vector<32x128xf32>
    %2 = tpu.matmul %0, %1, %cst {dimension_numbers = #tpu.dot_dimension_numbers<[1], [0], [0], [1], [0, 0, 1, 1], [], []>} : vector<32x3xbf16>, vector<3x128xbf16>, vector<32x128xf32> -> vector<32x128xf32>
    %c0_3 = arith.constant 0 : index
    %c0_4 = arith.constant 0 : index
    %3 = vector.load %arg3[%c0_3, %c0_4] : memref<1x128xf32, #tpu.memory_space<vmem>>, vector<1x128xf32>
    %4 = vector.broadcast %3 : vector<1x128xf32> to vector<32x128xf32>
    %5 = arith.addf %2, %4 : vector<32x128xf32>
    %c0_5 = arith.constant 0 : index
    %c0_6 = arith.constant 0 : index
    %6 = vector.load %arg1[%c0_5, %c0_6] : memref<2x64xbf16, #tpu.memory_space<vmem>>, vector<2x64xbf16>
    %c0_7 = arith.constant 0 : index
    %c0_8 = arith.constant 0 : index
    %7 = vector.load %arg4[%c0_7, %c0_8] : memref<64x640xbf16, #tpu.memory_space<vmem>>, vector<64x640xbf16>
    %cst_9 = arith.constant dense<0.000000e+00> : vector<2x640xf32>
    %8 = tpu.matmul %6, %7, %cst_9 {dimension_numbers = #tpu.dot_dimension_numbers<[1], [0], [0], [1], [0, 0, 1, 1], [], []>} : vector<2x64xbf16>, vector<64x640xbf16>, vector<2x640xf32> -> vector<2x640xf32>
    %c0_10 = arith.constant 0 : index
    %c0_11 = arith.constant 0 : index
    %9 = vector.load %arg5[%c0_10, %c0_11] : memref<1x640xf32, #tpu.memory_space<vmem>>, vector<1x640xf32>
    %10 = vector.broadcast %9 : vector<1x640xf32> to vector<2x640xf32>
    %11 = arith.addf %8, %10 : vector<2x640xf32>
    %12 = vector.extract_strided_slice %11 {offsets = [0, 0], sizes = [2, 128], strides = [1, 1]} : vector<2x640xf32> to vector<2x128xf32>
    %13 = vector.shape_cast %5 : vector<32x128xf32> to vector<2x16x128xf32>
    %14 = vector.shape_cast %12 : vector<2x128xf32> to vector<2x1x128xf32>
    %15 = vector.broadcast %14 : vector<2x1x128xf32> to vector<2x16x128xf32>
    %16 = arith.addf %13, %15 : vector<2x16x128xf32>
    %17 = vector.shape_cast %16 : vector<2x16x128xf32> to vector<32x128xf32>
    %c0_12 = arith.constant 0 : index
    %c0_13 = arith.constant 0 : index
    %c0_14 = arith.constant 0 : index
    %18 = vector.load %arg6[%c0_12, %c0_13, %c0_14] : memref<5x1x128xf32, #tpu.memory_space<vmem>>, vector<1x1x128xf32>
    %19 = vector.shape_cast %18 : vector<1x1x128xf32> to vector<1x128xf32>
    %c0_15 = arith.constant 0 : index
    %c0_16 = arith.constant 0 : index
    %c0_17 = arith.constant 0 : index
    %20 = vector.load %arg7[%c0_15, %c0_16, %c0_17] : memref<5x1x128xf32, #tpu.memory_space<vmem>>, vector<1x1x128xf32>
    %21 = vector.shape_cast %20 : vector<1x1x128xf32> to vector<1x128xf32>
    %cst_18 = arith.constant dense<0.000000e+00> : vector<128xf32>
    %22 = vector.multi_reduction <add>, %17, %cst_18 [0] : vector<32x128xf32> to vector<128xf32>
    %23 = vector.shape_cast %22 : vector<128xf32> to vector<1x128xf32>
    %cst_19 = arith.constant 3.125000e-02 : f32
    %24 = vector.broadcast %cst_19 : f32 to vector<1x128xf32>
    %25 = arith.mulf %23, %24 : vector<1x128xf32>
    %26 = arith.mulf %17, %17 : vector<32x128xf32>
    %cst_20 = arith.constant dense<0.000000e+00> : vector<128xf32>
    %27 = vector.multi_reduction <add>, %26, %cst_20 [0] : vector<32x128xf32> to vector<128xf32>
    %28 = vector.shape_cast %27 : vector<128xf32> to vector<1x128xf32>
    %cst_21 = arith.constant 3.125000e-02 : f32
    %29 = vector.broadcast %cst_21 : f32 to vector<1x128xf32>
    %30 = arith.mulf %28, %29 : vector<1x128xf32>
    %31 = arith.mulf %25, %25 : vector<1x128xf32>
    %32 = arith.subf %30, %31 : vector<1x128xf32>
    %cst_22 = arith.constant 0.000000e+00 : f32
    %33 = vector.broadcast %cst_22 : f32 to vector<1x128xf32>
    %34 = arith.maximumf %32, %33 : vector<1x128xf32>
    %cst_23 = arith.constant 9.99999974E-6 : f32
    %35 = vector.broadcast %cst_23 : f32 to vector<1x128xf32>
    %36 = arith.addf %34, %35 : vector<1x128xf32>
    %37 = math.rsqrt %36 : vector<1x128xf32>
    %38 = arith.mulf %19, %37 : vector<1x128xf32>
    %39 = arith.mulf %25, %38 : vector<1x128xf32>
    %40 = arith.subf %21, %39 : vector<1x128xf32>
    %41 = vector.broadcast %38 : vector<1x128xf32> to vector<32x128xf32>
    %42 = arith.mulf %17, %41 : vector<32x128xf32>
    %43 = vector.broadcast %40 : vector<1x128xf32> to vector<32x128xf32>
    %44 = arith.addf %42, %43 : vector<32x128xf32>
    %cst_24 = arith.constant 0.000000e+00 : f32
    %45 = vector.broadcast %cst_24 : f32 to vector<32x128xf32>
    %46 = arith.maximumf %44, %45 : vector<32x128xf32>
    %47 = arith.truncf %46 : vector<32x128xf32> to vector<32x128xbf16>
    %c0_25 = arith.constant 0 : index
    %c0_26 = arith.constant 0 : index
    %c0_27 = arith.constant 0 : index
    %48 = vector.load %arg10[%c0_25, %c0_26, %c0_27] : memref<5x128x128xbf16, #tpu.memory_space<vmem>>, vector<1x128x128xbf16>
    %49 = vector.shape_cast %48 : vector<1x128x128xbf16> to vector<128x128xbf16>
    %cst_28 = arith.constant dense<0.000000e+00> : vector<32x128xf32>
    %50 = tpu.matmul %47, %49, %cst_28 {dimension_numbers = #tpu.dot_dimension_numbers<[1], [0], [0], [1], [0, 0, 1, 1], [], []>} : vector<32x128xbf16>, vector<128x128xbf16>, vector<32x128xf32> -> vector<32x128xf32>
    %c0_29 = arith.constant 0 : index
    %c0_30 = arith.constant 0 : index
    %c0_31 = arith.constant 0 : index
    %51 = vector.load %arg8[%c0_29, %c0_30, %c0_31] : memref<5x1x128xf32, #tpu.memory_space<vmem>>, vector<1x1x128xf32>
    %52 = vector.shape_cast %51 : vector<1x1x128xf32> to vector<1x128xf32>
    %c0_32 = arith.constant 0 : index
    %c0_33 = arith.constant 0 : index
    %c0_34 = arith.constant 0 : index
    %53 = vector.load %arg9[%c0_32, %c0_33, %c0_34] : memref<5x1x128xf32, #tpu.memory_space<vmem>>, vector<1x1x128xf32>
    %54 = vector.shape_cast %53 : vector<1x1x128xf32> to vector<1x128xf32>
    %cst_35 = arith.constant dense<0.000000e+00> : vector<128xf32>
    %55 = vector.multi_reduction <add>, %50, %cst_35 [0] : vector<32x128xf32> to vector<128xf32>
    %56 = vector.shape_cast %55 : vector<128xf32> to vector<1x128xf32>
    %cst_36 = arith.constant 3.125000e-02 : f32
    %57 = vector.broadcast %cst_36 : f32 to vector<1x128xf32>
    %58 = arith.mulf %56, %57 : vector<1x128xf32>
    %59 = arith.mulf %50, %50 : vector<32x128xf32>
    %cst_37 = arith.constant dense<0.000000e+00> : vector<128xf32>
    %60 = vector.multi_reduction <add>, %59, %cst_37 [0] : vector<32x128xf32> to vector<128xf32>
    %61 = vector.shape_cast %60 : vector<128xf32> to vector<1x128xf32>
    %cst_38 = arith.constant 3.125000e-02 : f32
    %62 = vector.broadcast %cst_38 : f32 to vector<1x128xf32>
    %63 = arith.mulf %61, %62 : vector<1x128xf32>
    %64 = arith.mulf %58, %58 : vector<1x128xf32>
    %65 = arith.subf %63, %64 : vector<1x128xf32>
    %cst_39 = arith.constant 0.000000e+00 : f32
    %66 = vector.broadcast %cst_39 : f32 to vector<1x128xf32>
    %67 = arith.maximumf %65, %66 : vector<1x128xf32>
    %cst_40 = arith.constant 9.99999974E-6 : f32
    %68 = vector.broadcast %cst_40 : f32 to vector<1x128xf32>
    %69 = arith.addf %67, %68 : vector<1x128xf32>
    %70 = math.rsqrt %69 : vector<1x128xf32>
    %71 = arith.mulf %52, %70 : vector<1x128xf32>
    %72 = arith.mulf %58, %71 : vector<1x128xf32>
    %73 = arith.subf %54, %72 : vector<1x128xf32>
    %74 = vector.broadcast %71 : vector<1x128xf32> to vector<32x128xf32>
    %75 = arith.mulf %50, %74 : vector<32x128xf32>
    %76 = vector.broadcast %73 : vector<1x128xf32> to vector<32x128xf32>
    %77 = arith.addf %75, %76 : vector<32x128xf32>
    %cst_41 = arith.constant 0.000000e+00 : f32
    %78 = vector.broadcast %cst_41 : f32 to vector<32x128xf32>
    %79 = arith.maximumf %77, %78 : vector<32x128xf32>
    %80 = arith.truncf %79 : vector<32x128xf32> to vector<32x128xbf16>
    %c0_42 = arith.constant 0 : index
    %c0_43 = arith.constant 0 : index
    %c0_44 = arith.constant 0 : index
    %81 = vector.load %arg11[%c0_42, %c0_43, %c0_44] : memref<5x128x128xbf16, #tpu.memory_space<vmem>>, vector<1x128x128xbf16>
    %82 = vector.shape_cast %81 : vector<1x128x128xbf16> to vector<128x128xbf16>
    %cst_45 = arith.constant dense<0.000000e+00> : vector<32x128xf32>
    %83 = tpu.matmul %80, %82, %cst_45 {dimension_numbers = #tpu.dot_dimension_numbers<[1], [0], [0], [1], [0, 0, 1, 1], [], []>} : vector<32x128xbf16>, vector<128x128xbf16>, vector<32x128xf32> -> vector<32x128xf32>
    %84 = arith.addf %17, %83 : vector<32x128xf32>
    %c0_46 = arith.constant 0 : index
    %c0_47 = arith.constant 0 : index
    %c0_48 = arith.constant 0 : index
    %85 = vector.load %arg12[%c0_46, %c0_47, %c0_48] : memref<5x1x128xf32, #tpu.memory_space<vmem>>, vector<1x1x128xf32>
    %86 = vector.shape_cast %85 : vector<1x1x128xf32> to vector<1x128xf32>
    %87 = vector.broadcast %86 : vector<1x128xf32> to vector<32x128xf32>
    %88 = arith.addf %84, %87 : vector<32x128xf32>
    %89 = vector.extract_strided_slice %11 {offsets = [0, 128], sizes = [2, 128], strides = [1, 1]} : vector<2x640xf32> to vector<2x128xf32>
    %90 = vector.shape_cast %88 : vector<32x128xf32> to vector<2x16x128xf32>
    %91 = vector.shape_cast %89 : vector<2x128xf32> to vector<2x1x128xf32>
    %92 = vector.broadcast %91 : vector<2x1x128xf32> to vector<2x16x128xf32>
    %93 = arith.addf %90, %92 : vector<2x16x128xf32>
    %94 = vector.shape_cast %93 : vector<2x16x128xf32> to vector<32x128xf32>
    %c1 = arith.constant 1 : index
    %c0_49 = arith.constant 0 : index
    %c0_50 = arith.constant 0 : index
    %95 = vector.load %arg6[%c1, %c0_49, %c0_50] : memref<5x1x128xf32, #tpu.memory_space<vmem>>, vector<1x1x128xf32>
    %96 = vector.shape_cast %95 : vector<1x1x128xf32> to vector<1x128xf32>
    %c1_51 = arith.constant 1 : index
    %c0_52 = arith.constant 0 : index
    %c0_53 = arith.constant 0 : index
    %97 = vector.load %arg7[%c1_51, %c0_52, %c0_53] : memref<5x1x128xf32, #tpu.memory_space<vmem>>, vector<1x1x128xf32>
    %98 = vector.shape_cast %97 : vector<1x1x128xf32> to vector<1x128xf32>
    %cst_54 = arith.constant dense<0.000000e+00> : vector<128xf32>
    %99 = vector.multi_reduction <add>, %94, %cst_54 [0] : vector<32x128xf32> to vector<128xf32>
    %100 = vector.shape_cast %99 : vector<128xf32> to vector<1x128xf32>
    %cst_55 = arith.constant 3.125000e-02 : f32
    %101 = vector.broadcast %cst_55 : f32 to vector<1x128xf32>
    %102 = arith.mulf %100, %101 : vector<1x128xf32>
    %103 = arith.mulf %94, %94 : vector<32x128xf32>
    %cst_56 = arith.constant dense<0.000000e+00> : vector<128xf32>
    %104 = vector.multi_reduction <add>, %103, %cst_56 [0] : vector<32x128xf32> to vector<128xf32>
    %105 = vector.shape_cast %104 : vector<128xf32> to vector<1x128xf32>
    %cst_57 = arith.constant 3.125000e-02 : f32
    %106 = vector.broadcast %cst_57 : f32 to vector<1x128xf32>
    %107 = arith.mulf %105, %106 : vector<1x128xf32>
    %108 = arith.mulf %102, %102 : vector<1x128xf32>
    %109 = arith.subf %107, %108 : vector<1x128xf32>
    %cst_58 = arith.constant 0.000000e+00 : f32
    %110 = vector.broadcast %cst_58 : f32 to vector<1x128xf32>
    %111 = arith.maximumf %109, %110 : vector<1x128xf32>
    %cst_59 = arith.constant 9.99999974E-6 : f32
    %112 = vector.broadcast %cst_59 : f32 to vector<1x128xf32>
    %113 = arith.addf %111, %112 : vector<1x128xf32>
    %114 = math.rsqrt %113 : vector<1x128xf32>
    %115 = arith.mulf %96, %114 : vector<1x128xf32>
    %116 = arith.mulf %102, %115 : vector<1x128xf32>
    %117 = arith.subf %98, %116 : vector<1x128xf32>
    %118 = vector.broadcast %115 : vector<1x128xf32> to vector<32x128xf32>
    %119 = arith.mulf %94, %118 : vector<32x128xf32>
    %120 = vector.broadcast %117 : vector<1x128xf32> to vector<32x128xf32>
    %121 = arith.addf %119, %120 : vector<32x128xf32>
    %cst_60 = arith.constant 0.000000e+00 : f32
    %122 = vector.broadcast %cst_60 : f32 to vector<32x128xf32>
    %123 = arith.maximumf %121, %122 : vector<32x128xf32>
    %124 = arith.truncf %123 : vector<32x128xf32> to vector<32x128xbf16>
    %c1_61 = arith.constant 1 : index
    %c0_62 = arith.constant 0 : index
    %c0_63 = arith.constant 0 : index
    %125 = vector.load %arg10[%c1_61, %c0_62, %c0_63] : memref<5x128x128xbf16, #tpu.memory_space<vmem>>, vector<1x128x128xbf16>
    %126 = vector.shape_cast %125 : vector<1x128x128xbf16> to vector<128x128xbf16>
    %cst_64 = arith.constant dense<0.000000e+00> : vector<32x128xf32>
    %127 = tpu.matmul %124, %126, %cst_64 {dimension_numbers = #tpu.dot_dimension_numbers<[1], [0], [0], [1], [0, 0, 1, 1], [], []>} : vector<32x128xbf16>, vector<128x128xbf16>, vector<32x128xf32> -> vector<32x128xf32>
    %c1_65 = arith.constant 1 : index
    %c0_66 = arith.constant 0 : index
    %c0_67 = arith.constant 0 : index
    %128 = vector.load %arg8[%c1_65, %c0_66, %c0_67] : memref<5x1x128xf32, #tpu.memory_space<vmem>>, vector<1x1x128xf32>
    %129 = vector.shape_cast %128 : vector<1x1x128xf32> to vector<1x128xf32>
    %c1_68 = arith.constant 1 : index
    %c0_69 = arith.constant 0 : index
    %c0_70 = arith.constant 0 : index
    %130 = vector.load %arg9[%c1_68, %c0_69, %c0_70] : memref<5x1x128xf32, #tpu.memory_space<vmem>>, vector<1x1x128xf32>
    %131 = vector.shape_cast %130 : vector<1x1x128xf32> to vector<1x128xf32>
    %cst_71 = arith.constant dense<0.000000e+00> : vector<128xf32>
    %132 = vector.multi_reduction <add>, %127, %cst_71 [0] : vector<32x128xf32> to vector<128xf32>
    %133 = vector.shape_cast %132 : vector<128xf32> to vector<1x128xf32>
    %cst_72 = arith.constant 3.125000e-02 : f32
    %134 = vector.broadcast %cst_72 : f32 to vector<1x128xf32>
    %135 = arith.mulf %133, %134 : vector<1x128xf32>
    %136 = arith.mulf %127, %127 : vector<32x128xf32>
    %cst_73 = arith.constant dense<0.000000e+00> : vector<128xf32>
    %137 = vector.multi_reduction <add>, %136, %cst_73 [0] : vector<32x128xf32> to vector<128xf32>
    %138 = vector.shape_cast %137 : vector<128xf32> to vector<1x128xf32>
    %cst_74 = arith.constant 3.125000e-02 : f32
    %139 = vector.broadcast %cst_74 : f32 to vector<1x128xf32>
    %140 = arith.mulf %138, %139 : vector<1x128xf32>
    %141 = arith.mulf %135, %135 : vector<1x128xf32>
    %142 = arith.subf %140, %141 : vector<1x128xf32>
    %cst_75 = arith.constant 0.000000e+00 : f32
    %143 = vector.broadcast %cst_75 : f32 to vector<1x128xf32>
    %144 = arith.maximumf %142, %143 : vector<1x128xf32>
    %cst_76 = arith.constant 9.99999974E-6 : f32
    %145 = vector.broadcast %cst_76 : f32 to vector<1x128xf32>
    %146 = arith.addf %144, %145 : vector<1x128xf32>
    %147 = math.rsqrt %146 : vector<1x128xf32>
    %148 = arith.mulf %129, %147 : vector<1x128xf32>
    %149 = arith.mulf %135, %148 : vector<1x128xf32>
    %150 = arith.subf %131, %149 : vector<1x128xf32>
    %151 = vector.broadcast %148 : vector<1x128xf32> to vector<32x128xf32>
    %152 = arith.mulf %127, %151 : vector<32x128xf32>
    %153 = vector.broadcast %150 : vector<1x128xf32> to vector<32x128xf32>
    %154 = arith.addf %152, %153 : vector<32x128xf32>
    %cst_77 = arith.constant 0.000000e+00 : f32
    %155 = vector.broadcast %cst_77 : f32 to vector<32x128xf32>
    %156 = arith.maximumf %154, %155 : vector<32x128xf32>
    %157 = arith.truncf %156 : vector<32x128xf32> to vector<32x128xbf16>
    %c1_78 = arith.constant 1 : index
    %c0_79 = arith.constant 0 : index
    %c0_80 = arith.constant 0 : index
    %158 = vector.load %arg11[%c1_78, %c0_79, %c0_80] : memref<5x128x128xbf16, #tpu.memory_space<vmem>>, vector<1x128x128xbf16>
    %159 = vector.shape_cast %158 : vector<1x128x128xbf16> to vector<128x128xbf16>
    %cst_81 = arith.constant dense<0.000000e+00> : vector<32x128xf32>
    %160 = tpu.matmul %157, %159, %cst_81 {dimension_numbers = #tpu.dot_dimension_numbers<[1], [0], [0], [1], [0, 0, 1, 1], [], []>} : vector<32x128xbf16>, vector<128x128xbf16>, vector<32x128xf32> -> vector<32x128xf32>
    %161 = arith.addf %94, %160 : vector<32x128xf32>
    %c1_82 = arith.constant 1 : index
    %c0_83 = arith.constant 0 : index
    %c0_84 = arith.constant 0 : index
    %162 = vector.load %arg12[%c1_82, %c0_83, %c0_84] : memref<5x1x128xf32, #tpu.memory_space<vmem>>, vector<1x1x128xf32>
    %163 = vector.shape_cast %162 : vector<1x1x128xf32> to vector<1x128xf32>
    %164 = vector.broadcast %163 : vector<1x128xf32> to vector<32x128xf32>
    %165 = arith.addf %161, %164 : vector<32x128xf32>
    %166 = vector.extract_strided_slice %11 {offsets = [0, 256], sizes = [2, 128], strides = [1, 1]} : vector<2x640xf32> to vector<2x128xf32>
    %167 = vector.shape_cast %165 : vector<32x128xf32> to vector<2x16x128xf32>
    %168 = vector.shape_cast %166 : vector<2x128xf32> to vector<2x1x128xf32>
    %169 = vector.broadcast %168 : vector<2x1x128xf32> to vector<2x16x128xf32>
    %170 = arith.addf %167, %169 : vector<2x16x128xf32>
    %171 = vector.shape_cast %170 : vector<2x16x128xf32> to vector<32x128xf32>
    %c2 = arith.constant 2 : index
    %c0_85 = arith.constant 0 : index
    %c0_86 = arith.constant 0 : index
    %172 = vector.load %arg6[%c2, %c0_85, %c0_86] : memref<5x1x128xf32, #tpu.memory_space<vmem>>, vector<1x1x128xf32>
    %173 = vector.shape_cast %172 : vector<1x1x128xf32> to vector<1x128xf32>
    %c2_87 = arith.constant 2 : index
    %c0_88 = arith.constant 0 : index
    %c0_89 = arith.constant 0 : index
    %174 = vector.load %arg7[%c2_87, %c0_88, %c0_89] : memref<5x1x128xf32, #tpu.memory_space<vmem>>, vector<1x1x128xf32>
    %175 = vector.shape_cast %174 : vector<1x1x128xf32> to vector<1x128xf32>
    %cst_90 = arith.constant dense<0.000000e+00> : vector<128xf32>
    %176 = vector.multi_reduction <add>, %171, %cst_90 [0] : vector<32x128xf32> to vector<128xf32>
    %177 = vector.shape_cast %176 : vector<128xf32> to vector<1x128xf32>
    %cst_91 = arith.constant 3.125000e-02 : f32
    %178 = vector.broadcast %cst_91 : f32 to vector<1x128xf32>
    %179 = arith.mulf %177, %178 : vector<1x128xf32>
    %180 = arith.mulf %171, %171 : vector<32x128xf32>
    %cst_92 = arith.constant dense<0.000000e+00> : vector<128xf32>
    %181 = vector.multi_reduction <add>, %180, %cst_92 [0] : vector<32x128xf32> to vector<128xf32>
    %182 = vector.shape_cast %181 : vector<128xf32> to vector<1x128xf32>
    %cst_93 = arith.constant 3.125000e-02 : f32
    %183 = vector.broadcast %cst_93 : f32 to vector<1x128xf32>
    %184 = arith.mulf %182, %183 : vector<1x128xf32>
    %185 = arith.mulf %179, %179 : vector<1x128xf32>
    %186 = arith.subf %184, %185 : vector<1x128xf32>
    %cst_94 = arith.constant 0.000000e+00 : f32
    %187 = vector.broadcast %cst_94 : f32 to vector<1x128xf32>
    %188 = arith.maximumf %186, %187 : vector<1x128xf32>
    %cst_95 = arith.constant 9.99999974E-6 : f32
    %189 = vector.broadcast %cst_95 : f32 to vector<1x128xf32>
    %190 = arith.addf %188, %189 : vector<1x128xf32>
    %191 = math.rsqrt %190 : vector<1x128xf32>
    %192 = arith.mulf %173, %191 : vector<1x128xf32>
    %193 = arith.mulf %179, %192 : vector<1x128xf32>
    %194 = arith.subf %175, %193 : vector<1x128xf32>
    %195 = vector.broadcast %192 : vector<1x128xf32> to vector<32x128xf32>
    %196 = arith.mulf %171, %195 : vector<32x128xf32>
    %197 = vector.broadcast %194 : vector<1x128xf32> to vector<32x128xf32>
    %198 = arith.addf %196, %197 : vector<32x128xf32>
    %cst_96 = arith.constant 0.000000e+00 : f32
    %199 = vector.broadcast %cst_96 : f32 to vector<32x128xf32>
    %200 = arith.maximumf %198, %199 : vector<32x128xf32>
    %201 = arith.truncf %200 : vector<32x128xf32> to vector<32x128xbf16>
    %c2_97 = arith.constant 2 : index
    %c0_98 = arith.constant 0 : index
    %c0_99 = arith.constant 0 : index
    %202 = vector.load %arg10[%c2_97, %c0_98, %c0_99] : memref<5x128x128xbf16, #tpu.memory_space<vmem>>, vector<1x128x128xbf16>
    %203 = vector.shape_cast %202 : vector<1x128x128xbf16> to vector<128x128xbf16>
    %cst_100 = arith.constant dense<0.000000e+00> : vector<32x128xf32>
    %204 = tpu.matmul %201, %203, %cst_100 {dimension_numbers = #tpu.dot_dimension_numbers<[1], [0], [0], [1], [0, 0, 1, 1], [], []>} : vector<32x128xbf16>, vector<128x128xbf16>, vector<32x128xf32> -> vector<32x128xf32>
    %c2_101 = arith.constant 2 : index
    %c0_102 = arith.constant 0 : index
    %c0_103 = arith.constant 0 : index
    %205 = vector.load %arg8[%c2_101, %c0_102, %c0_103] : memref<5x1x128xf32, #tpu.memory_space<vmem>>, vector<1x1x128xf32>
    %206 = vector.shape_cast %205 : vector<1x1x128xf32> to vector<1x128xf32>
    %c2_104 = arith.constant 2 : index
    %c0_105 = arith.constant 0 : index
    %c0_106 = arith.constant 0 : index
    %207 = vector.load %arg9[%c2_104, %c0_105, %c0_106] : memref<5x1x128xf32, #tpu.memory_space<vmem>>, vector<1x1x128xf32>
    %208 = vector.shape_cast %207 : vector<1x1x128xf32> to vector<1x128xf32>
    %cst_107 = arith.constant dense<0.000000e+00> : vector<128xf32>
    %209 = vector.multi_reduction <add>, %204, %cst_107 [0] : vector<32x128xf32> to vector<128xf32>
    %210 = vector.shape_cast %209 : vector<128xf32> to vector<1x128xf32>
    %cst_108 = arith.constant 3.125000e-02 : f32
    %211 = vector.broadcast %cst_108 : f32 to vector<1x128xf32>
    %212 = arith.mulf %210, %211 : vector<1x128xf32>
    %213 = arith.mulf %204, %204 : vector<32x128xf32>
    %cst_109 = arith.constant dense<0.000000e+00> : vector<128xf32>
    %214 = vector.multi_reduction <add>, %213, %cst_109 [0] : vector<32x128xf32> to vector<128xf32>
    %215 = vector.shape_cast %214 : vector<128xf32> to vector<1x128xf32>
    %cst_110 = arith.constant 3.125000e-02 : f32
    %216 = vector.broadcast %cst_110 : f32 to vector<1x128xf32>
    %217 = arith.mulf %215, %216 : vector<1x128xf32>
    %218 = arith.mulf %212, %212 : vector<1x128xf32>
    %219 = arith.subf %217, %218 : vector<1x128xf32>
    %cst_111 = arith.constant 0.000000e+00 : f32
    %220 = vector.broadcast %cst_111 : f32 to vector<1x128xf32>
    %221 = arith.maximumf %219, %220 : vector<1x128xf32>
    %cst_112 = arith.constant 9.99999974E-6 : f32
    %222 = vector.broadcast %cst_112 : f32 to vector<1x128xf32>
    %223 = arith.addf %221, %222 : vector<1x128xf32>
    %224 = math.rsqrt %223 : vector<1x128xf32>
    %225 = arith.mulf %206, %224 : vector<1x128xf32>
    %226 = arith.mulf %212, %225 : vector<1x128xf32>
    %227 = arith.subf %208, %226 : vector<1x128xf32>
    %228 = vector.broadcast %225 : vector<1x128xf32> to vector<32x128xf32>
    %229 = arith.mulf %204, %228 : vector<32x128xf32>
    %230 = vector.broadcast %227 : vector<1x128xf32> to vector<32x128xf32>
    %231 = arith.addf %229, %230 : vector<32x128xf32>
    %cst_113 = arith.constant 0.000000e+00 : f32
    %232 = vector.broadcast %cst_113 : f32 to vector<32x128xf32>
    %233 = arith.maximumf %231, %232 : vector<32x128xf32>
    %234 = arith.truncf %233 : vector<32x128xf32> to vector<32x128xbf16>
    %c2_114 = arith.constant 2 : index
    %c0_115 = arith.constant 0 : index
    %c0_116 = arith.constant 0 : index
    %235 = vector.load %arg11[%c2_114, %c0_115, %c0_116] : memref<5x128x128xbf16, #tpu.memory_space<vmem>>, vector<1x128x128xbf16>
    %236 = vector.shape_cast %235 : vector<1x128x128xbf16> to vector<128x128xbf16>
    %cst_117 = arith.constant dense<0.000000e+00> : vector<32x128xf32>
    %237 = tpu.matmul %234, %236, %cst_117 {dimension_numbers = #tpu.dot_dimension_numbers<[1], [0], [0], [1], [0, 0, 1, 1], [], []>} : vector<32x128xbf16>, vector<128x128xbf16>, vector<32x128xf32> -> vector<32x128xf32>
    %238 = arith.addf %171, %237 : vector<32x128xf32>
    %c2_118 = arith.constant 2 : index
    %c0_119 = arith.constant 0 : index
    %c0_120 = arith.constant 0 : index
    %239 = vector.load %arg12[%c2_118, %c0_119, %c0_120] : memref<5x1x128xf32, #tpu.memory_space<vmem>>, vector<1x1x128xf32>
    %240 = vector.shape_cast %239 : vector<1x1x128xf32> to vector<1x128xf32>
    %241 = vector.broadcast %240 : vector<1x128xf32> to vector<32x128xf32>
    %242 = arith.addf %238, %241 : vector<32x128xf32>
    %243 = vector.extract_strided_slice %11 {offsets = [0, 384], sizes = [2, 128], strides = [1, 1]} : vector<2x640xf32> to vector<2x128xf32>
    %244 = vector.shape_cast %242 : vector<32x128xf32> to vector<2x16x128xf32>
    %245 = vector.shape_cast %243 : vector<2x128xf32> to vector<2x1x128xf32>
    %246 = vector.broadcast %245 : vector<2x1x128xf32> to vector<2x16x128xf32>
    %247 = arith.addf %244, %246 : vector<2x16x128xf32>
    %248 = vector.shape_cast %247 : vector<2x16x128xf32> to vector<32x128xf32>
    %c3 = arith.constant 3 : index
    %c0_121 = arith.constant 0 : index
    %c0_122 = arith.constant 0 : index
    %249 = vector.load %arg6[%c3, %c0_121, %c0_122] : memref<5x1x128xf32, #tpu.memory_space<vmem>>, vector<1x1x128xf32>
    %250 = vector.shape_cast %249 : vector<1x1x128xf32> to vector<1x128xf32>
    %c3_123 = arith.constant 3 : index
    %c0_124 = arith.constant 0 : index
    %c0_125 = arith.constant 0 : index
    %251 = vector.load %arg7[%c3_123, %c0_124, %c0_125] : memref<5x1x128xf32, #tpu.memory_space<vmem>>, vector<1x1x128xf32>
    %252 = vector.shape_cast %251 : vector<1x1x128xf32> to vector<1x128xf32>
    %cst_126 = arith.constant dense<0.000000e+00> : vector<128xf32>
    %253 = vector.multi_reduction <add>, %248, %cst_126 [0] : vector<32x128xf32> to vector<128xf32>
    %254 = vector.shape_cast %253 : vector<128xf32> to vector<1x128xf32>
    %cst_127 = arith.constant 3.125000e-02 : f32
    %255 = vector.broadcast %cst_127 : f32 to vector<1x128xf32>
    %256 = arith.mulf %254, %255 : vector<1x128xf32>
    %257 = arith.mulf %248, %248 : vector<32x128xf32>
    %cst_128 = arith.constant dense<0.000000e+00> : vector<128xf32>
    %258 = vector.multi_reduction <add>, %257, %cst_128 [0] : vector<32x128xf32> to vector<128xf32>
    %259 = vector.shape_cast %258 : vector<128xf32> to vector<1x128xf32>
    %cst_129 = arith.constant 3.125000e-02 : f32
    %260 = vector.broadcast %cst_129 : f32 to vector<1x128xf32>
    %261 = arith.mulf %259, %260 : vector<1x128xf32>
    %262 = arith.mulf %256, %256 : vector<1x128xf32>
    %263 = arith.subf %261, %262 : vector<1x128xf32>
    %cst_130 = arith.constant 0.000000e+00 : f32
    %264 = vector.broadcast %cst_130 : f32 to vector<1x128xf32>
    %265 = arith.maximumf %263, %264 : vector<1x128xf32>
    %cst_131 = arith.constant 9.99999974E-6 : f32
    %266 = vector.broadcast %cst_131 : f32 to vector<1x128xf32>
    %267 = arith.addf %265, %266 : vector<1x128xf32>
    %268 = math.rsqrt %267 : vector<1x128xf32>
    %269 = arith.mulf %250, %268 : vector<1x128xf32>
    %270 = arith.mulf %256, %269 : vector<1x128xf32>
    %271 = arith.subf %252, %270 : vector<1x128xf32>
    %272 = vector.broadcast %269 : vector<1x128xf32> to vector<32x128xf32>
    %273 = arith.mulf %248, %272 : vector<32x128xf32>
    %274 = vector.broadcast %271 : vector<1x128xf32> to vector<32x128xf32>
    %275 = arith.addf %273, %274 : vector<32x128xf32>
    %cst_132 = arith.constant 0.000000e+00 : f32
    %276 = vector.broadcast %cst_132 : f32 to vector<32x128xf32>
    %277 = arith.maximumf %275, %276 : vector<32x128xf32>
    %278 = arith.truncf %277 : vector<32x128xf32> to vector<32x128xbf16>
    %c3_133 = arith.constant 3 : index
    %c0_134 = arith.constant 0 : index
    %c0_135 = arith.constant 0 : index
    %279 = vector.load %arg10[%c3_133, %c0_134, %c0_135] : memref<5x128x128xbf16, #tpu.memory_space<vmem>>, vector<1x128x128xbf16>
    %280 = vector.shape_cast %279 : vector<1x128x128xbf16> to vector<128x128xbf16>
    %cst_136 = arith.constant dense<0.000000e+00> : vector<32x128xf32>
    %281 = tpu.matmul %278, %280, %cst_136 {dimension_numbers = #tpu.dot_dimension_numbers<[1], [0], [0], [1], [0, 0, 1, 1], [], []>} : vector<32x128xbf16>, vector<128x128xbf16>, vector<32x128xf32> -> vector<32x128xf32>
    %c3_137 = arith.constant 3 : index
    %c0_138 = arith.constant 0 : index
    %c0_139 = arith.constant 0 : index
    %282 = vector.load %arg8[%c3_137, %c0_138, %c0_139] : memref<5x1x128xf32, #tpu.memory_space<vmem>>, vector<1x1x128xf32>
    %283 = vector.shape_cast %282 : vector<1x1x128xf32> to vector<1x128xf32>
    %c3_140 = arith.constant 3 : index
    %c0_141 = arith.constant 0 : index
    %c0_142 = arith.constant 0 : index
    %284 = vector.load %arg9[%c3_140, %c0_141, %c0_142] : memref<5x1x128xf32, #tpu.memory_space<vmem>>, vector<1x1x128xf32>
    %285 = vector.shape_cast %284 : vector<1x1x128xf32> to vector<1x128xf32>
    %cst_143 = arith.constant dense<0.000000e+00> : vector<128xf32>
    %286 = vector.multi_reduction <add>, %281, %cst_143 [0] : vector<32x128xf32> to vector<128xf32>
    %287 = vector.shape_cast %286 : vector<128xf32> to vector<1x128xf32>
    %cst_144 = arith.constant 3.125000e-02 : f32
    %288 = vector.broadcast %cst_144 : f32 to vector<1x128xf32>
    %289 = arith.mulf %287, %288 : vector<1x128xf32>
    %290 = arith.mulf %281, %281 : vector<32x128xf32>
    %cst_145 = arith.constant dense<0.000000e+00> : vector<128xf32>
    %291 = vector.multi_reduction <add>, %290, %cst_145 [0] : vector<32x128xf32> to vector<128xf32>
    %292 = vector.shape_cast %291 : vector<128xf32> to vector<1x128xf32>
    %cst_146 = arith.constant 3.125000e-02 : f32
    %293 = vector.broadcast %cst_146 : f32 to vector<1x128xf32>
    %294 = arith.mulf %292, %293 : vector<1x128xf32>
    %295 = arith.mulf %289, %289 : vector<1x128xf32>
    %296 = arith.subf %294, %295 : vector<1x128xf32>
    %cst_147 = arith.constant 0.000000e+00 : f32
    %297 = vector.broadcast %cst_147 : f32 to vector<1x128xf32>
    %298 = arith.maximumf %296, %297 : vector<1x128xf32>
    %cst_148 = arith.constant 9.99999974E-6 : f32
    %299 = vector.broadcast %cst_148 : f32 to vector<1x128xf32>
    %300 = arith.addf %298, %299 : vector<1x128xf32>
    %301 = math.rsqrt %300 : vector<1x128xf32>
    %302 = arith.mulf %283, %301 : vector<1x128xf32>
    %303 = arith.mulf %289, %302 : vector<1x128xf32>
    %304 = arith.subf %285, %303 : vector<1x128xf32>
    %305 = vector.broadcast %302 : vector<1x128xf32> to vector<32x128xf32>
    %306 = arith.mulf %281, %305 : vector<32x128xf32>
    %307 = vector.broadcast %304 : vector<1x128xf32> to vector<32x128xf32>
    %308 = arith.addf %306, %307 : vector<32x128xf32>
    %cst_149 = arith.constant 0.000000e+00 : f32
    %309 = vector.broadcast %cst_149 : f32 to vector<32x128xf32>
    %310 = arith.maximumf %308, %309 : vector<32x128xf32>
    %311 = arith.truncf %310 : vector<32x128xf32> to vector<32x128xbf16>
    %c3_150 = arith.constant 3 : index
    %c0_151 = arith.constant 0 : index
    %c0_152 = arith.constant 0 : index
    %312 = vector.load %arg11[%c3_150, %c0_151, %c0_152] : memref<5x128x128xbf16, #tpu.memory_space<vmem>>, vector<1x128x128xbf16>
    %313 = vector.shape_cast %312 : vector<1x128x128xbf16> to vector<128x128xbf16>
    %cst_153 = arith.constant dense<0.000000e+00> : vector<32x128xf32>
    %314 = tpu.matmul %311, %313, %cst_153 {dimension_numbers = #tpu.dot_dimension_numbers<[1], [0], [0], [1], [0, 0, 1, 1], [], []>} : vector<32x128xbf16>, vector<128x128xbf16>, vector<32x128xf32> -> vector<32x128xf32>
    %315 = arith.addf %248, %314 : vector<32x128xf32>
    %c3_154 = arith.constant 3 : index
    %c0_155 = arith.constant 0 : index
    %c0_156 = arith.constant 0 : index
    %316 = vector.load %arg12[%c3_154, %c0_155, %c0_156] : memref<5x1x128xf32, #tpu.memory_space<vmem>>, vector<1x1x128xf32>
    %317 = vector.shape_cast %316 : vector<1x1x128xf32> to vector<1x128xf32>
    %318 = vector.broadcast %317 : vector<1x128xf32> to vector<32x128xf32>
    %319 = arith.addf %315, %318 : vector<32x128xf32>
    %320 = vector.extract_strided_slice %11 {offsets = [0, 512], sizes = [2, 128], strides = [1, 1]} : vector<2x640xf32> to vector<2x128xf32>
    %321 = vector.shape_cast %319 : vector<32x128xf32> to vector<2x16x128xf32>
    %322 = vector.shape_cast %320 : vector<2x128xf32> to vector<2x1x128xf32>
    %323 = vector.broadcast %322 : vector<2x1x128xf32> to vector<2x16x128xf32>
    %324 = arith.addf %321, %323 : vector<2x16x128xf32>
    %325 = vector.shape_cast %324 : vector<2x16x128xf32> to vector<32x128xf32>
    %c4 = arith.constant 4 : index
    %c0_157 = arith.constant 0 : index
    %c0_158 = arith.constant 0 : index
    %326 = vector.load %arg6[%c4, %c0_157, %c0_158] : memref<5x1x128xf32, #tpu.memory_space<vmem>>, vector<1x1x128xf32>
    %327 = vector.shape_cast %326 : vector<1x1x128xf32> to vector<1x128xf32>
    %c4_159 = arith.constant 4 : index
    %c0_160 = arith.constant 0 : index
    %c0_161 = arith.constant 0 : index
    %328 = vector.load %arg7[%c4_159, %c0_160, %c0_161] : memref<5x1x128xf32, #tpu.memory_space<vmem>>, vector<1x1x128xf32>
    %329 = vector.shape_cast %328 : vector<1x1x128xf32> to vector<1x128xf32>
    %cst_162 = arith.constant dense<0.000000e+00> : vector<128xf32>
    %330 = vector.multi_reduction <add>, %325, %cst_162 [0] : vector<32x128xf32> to vector<128xf32>
    %331 = vector.shape_cast %330 : vector<128xf32> to vector<1x128xf32>
    %cst_163 = arith.constant 3.125000e-02 : f32
    %332 = vector.broadcast %cst_163 : f32 to vector<1x128xf32>
    %333 = arith.mulf %331, %332 : vector<1x128xf32>
    %334 = arith.mulf %325, %325 : vector<32x128xf32>
    %cst_164 = arith.constant dense<0.000000e+00> : vector<128xf32>
    %335 = vector.multi_reduction <add>, %334, %cst_164 [0] : vector<32x128xf32> to vector<128xf32>
    %336 = vector.shape_cast %335 : vector<128xf32> to vector<1x128xf32>
    %cst_165 = arith.constant 3.125000e-02 : f32
    %337 = vector.broadcast %cst_165 : f32 to vector<1x128xf32>
    %338 = arith.mulf %336, %337 : vector<1x128xf32>
    %339 = arith.mulf %333, %333 : vector<1x128xf32>
    %340 = arith.subf %338, %339 : vector<1x128xf32>
    %cst_166 = arith.constant 0.000000e+00 : f32
    %341 = vector.broadcast %cst_166 : f32 to vector<1x128xf32>
    %342 = arith.maximumf %340, %341 : vector<1x128xf32>
    %cst_167 = arith.constant 9.99999974E-6 : f32
    %343 = vector.broadcast %cst_167 : f32 to vector<1x128xf32>
    %344 = arith.addf %342, %343 : vector<1x128xf32>
    %345 = math.rsqrt %344 : vector<1x128xf32>
    %346 = arith.mulf %327, %345 : vector<1x128xf32>
    %347 = arith.mulf %333, %346 : vector<1x128xf32>
    %348 = arith.subf %329, %347 : vector<1x128xf32>
    %349 = vector.broadcast %346 : vector<1x128xf32> to vector<32x128xf32>
    %350 = arith.mulf %325, %349 : vector<32x128xf32>
    %351 = vector.broadcast %348 : vector<1x128xf32> to vector<32x128xf32>
    %352 = arith.addf %350, %351 : vector<32x128xf32>
    %cst_168 = arith.constant 0.000000e+00 : f32
    %353 = vector.broadcast %cst_168 : f32 to vector<32x128xf32>
    %354 = arith.maximumf %352, %353 : vector<32x128xf32>
    %355 = arith.truncf %354 : vector<32x128xf32> to vector<32x128xbf16>
    %c4_169 = arith.constant 4 : index
    %c0_170 = arith.constant 0 : index
    %c0_171 = arith.constant 0 : index
    %356 = vector.load %arg10[%c4_169, %c0_170, %c0_171] : memref<5x128x128xbf16, #tpu.memory_space<vmem>>, vector<1x128x128xbf16>
    %357 = vector.shape_cast %356 : vector<1x128x128xbf16> to vector<128x128xbf16>
    %cst_172 = arith.constant dense<0.000000e+00> : vector<32x128xf32>
    %358 = tpu.matmul %355, %357, %cst_172 {dimension_numbers = #tpu.dot_dimension_numbers<[1], [0], [0], [1], [0, 0, 1, 1], [], []>} : vector<32x128xbf16>, vector<128x128xbf16>, vector<32x128xf32> -> vector<32x128xf32>
    %c4_173 = arith.constant 4 : index
    %c0_174 = arith.constant 0 : index
    %c0_175 = arith.constant 0 : index
    %359 = vector.load %arg8[%c4_173, %c0_174, %c0_175] : memref<5x1x128xf32, #tpu.memory_space<vmem>>, vector<1x1x128xf32>
    %360 = vector.shape_cast %359 : vector<1x1x128xf32> to vector<1x128xf32>
    %c4_176 = arith.constant 4 : index
    %c0_177 = arith.constant 0 : index
    %c0_178 = arith.constant 0 : index
    %361 = vector.load %arg9[%c4_176, %c0_177, %c0_178] : memref<5x1x128xf32, #tpu.memory_space<vmem>>, vector<1x1x128xf32>
    %362 = vector.shape_cast %361 : vector<1x1x128xf32> to vector<1x128xf32>
    %cst_179 = arith.constant dense<0.000000e+00> : vector<128xf32>
    %363 = vector.multi_reduction <add>, %358, %cst_179 [0] : vector<32x128xf32> to vector<128xf32>
    %364 = vector.shape_cast %363 : vector<128xf32> to vector<1x128xf32>
    %cst_180 = arith.constant 3.125000e-02 : f32
    %365 = vector.broadcast %cst_180 : f32 to vector<1x128xf32>
    %366 = arith.mulf %364, %365 : vector<1x128xf32>
    %367 = arith.mulf %358, %358 : vector<32x128xf32>
    %cst_181 = arith.constant dense<0.000000e+00> : vector<128xf32>
    %368 = vector.multi_reduction <add>, %367, %cst_181 [0] : vector<32x128xf32> to vector<128xf32>
    %369 = vector.shape_cast %368 : vector<128xf32> to vector<1x128xf32>
    %cst_182 = arith.constant 3.125000e-02 : f32
    %370 = vector.broadcast %cst_182 : f32 to vector<1x128xf32>
    %371 = arith.mulf %369, %370 : vector<1x128xf32>
    %372 = arith.mulf %366, %366 : vector<1x128xf32>
    %373 = arith.subf %371, %372 : vector<1x128xf32>
    %cst_183 = arith.constant 0.000000e+00 : f32
    %374 = vector.broadcast %cst_183 : f32 to vector<1x128xf32>
    %375 = arith.maximumf %373, %374 : vector<1x128xf32>
    %cst_184 = arith.constant 9.99999974E-6 : f32
    %376 = vector.broadcast %cst_184 : f32 to vector<1x128xf32>
    %377 = arith.addf %375, %376 : vector<1x128xf32>
    %378 = math.rsqrt %377 : vector<1x128xf32>
    %379 = arith.mulf %360, %378 : vector<1x128xf32>
    %380 = arith.mulf %366, %379 : vector<1x128xf32>
    %381 = arith.subf %362, %380 : vector<1x128xf32>
    %382 = vector.broadcast %379 : vector<1x128xf32> to vector<32x128xf32>
    %383 = arith.mulf %358, %382 : vector<32x128xf32>
    %384 = vector.broadcast %381 : vector<1x128xf32> to vector<32x128xf32>
    %385 = arith.addf %383, %384 : vector<32x128xf32>
    %cst_185 = arith.constant 0.000000e+00 : f32
    %386 = vector.broadcast %cst_185 : f32 to vector<32x128xf32>
    %387 = arith.maximumf %385, %386 : vector<32x128xf32>
    %388 = arith.truncf %387 : vector<32x128xf32> to vector<32x128xbf16>
    %c4_186 = arith.constant 4 : index
    %c0_187 = arith.constant 0 : index
    %c0_188 = arith.constant 0 : index
    %389 = vector.load %arg11[%c4_186, %c0_187, %c0_188] : memref<5x128x128xbf16, #tpu.memory_space<vmem>>, vector<1x128x128xbf16>
    %390 = vector.shape_cast %389 : vector<1x128x128xbf16> to vector<128x128xbf16>
    %cst_189 = arith.constant dense<0.000000e+00> : vector<32x128xf32>
    %391 = tpu.matmul %388, %390, %cst_189 {dimension_numbers = #tpu.dot_dimension_numbers<[1], [0], [0], [1], [0, 0, 1, 1], [], []>} : vector<32x128xbf16>, vector<128x128xbf16>, vector<32x128xf32> -> vector<32x128xf32>
    %392 = arith.addf %325, %391 : vector<32x128xf32>
    %c4_190 = arith.constant 4 : index
    %c0_191 = arith.constant 0 : index
    %c0_192 = arith.constant 0 : index
    %393 = vector.load %arg12[%c4_190, %c0_191, %c0_192] : memref<5x1x128xf32, #tpu.memory_space<vmem>>, vector<1x1x128xf32>
    %394 = vector.shape_cast %393 : vector<1x1x128xf32> to vector<1x128xf32>
    %395 = vector.broadcast %394 : vector<1x128xf32> to vector<32x128xf32>
    %396 = arith.addf %392, %395 : vector<32x128xf32>
    %cst_193 = arith.constant 0.000000e+00 : f32
    %397 = vector.broadcast %cst_193 : f32 to vector<32x128xf32>
    %398 = arith.maximumf %396, %397 : vector<32x128xf32>
    %399 = arith.truncf %398 : vector<32x128xf32> to vector<32x128xbf16>
    %c0_194 = arith.constant 0 : index
    %c0_195 = arith.constant 0 : index
    %400 = vector.load %arg13[%c0_194, %c0_195] : memref<128x128xbf16, #tpu.memory_space<vmem>>, vector<128x128xbf16>
    %cst_196 = arith.constant dense<0.000000e+00> : vector<32x128xf32>
    %401 = tpu.matmul %399, %400, %cst_196 {dimension_numbers = #tpu.dot_dimension_numbers<[1], [0], [0], [1], [0, 0, 1, 1], [], []>} : vector<32x128xbf16>, vector<128x128xbf16>, vector<32x128xf32> -> vector<32x128xf32>
    %c0_197 = arith.constant 0 : index
    %c0_198 = arith.constant 0 : index
    %402 = vector.load %arg14[%c0_197, %c0_198] : memref<1x128xf32, #tpu.memory_space<vmem>>, vector<1x128xf32>
    %403 = vector.broadcast %402 : vector<1x128xf32> to vector<32x128xf32>
    %404 = arith.addf %401, %403 : vector<32x128xf32>
    %405 = arith.negf %404 : vector<32x128xf32>
    %406 = math.exp %405 : vector<32x128xf32>
    %cst_199 = arith.constant 1.000000e+00 : f32
    %407 = vector.broadcast %cst_199 : f32 to vector<32x128xf32>
    %408 = arith.addf %407, %406 : vector<32x128xf32>
    %409 = arith.divf %407, %408 : vector<32x128xf32>
    %410 = arith.truncf %409 : vector<32x128xf32> to vector<32x128xbf16>
    %c0_200 = arith.constant 0 : index
    %c0_201 = arith.constant 0 : index
    %411 = vector.load %arg15[%c0_200, %c0_201] : memref<32x128xbf16, #tpu.memory_space<vmem>>, vector<32x128xbf16>
    tpu.vector_store %arg15[%c0_200, %c0_201], %410 {strides = array<i32>} : memref<32x128xbf16, #tpu.memory_space<vmem>>, vector<32x128xbf16>,
    return
  }
}

</mosaic_0001>

<bundles_post_ra>
// kernel: texture_field_forward.1
= control target key start
LH: loop header
LB: loop body
LE: loop exit
PB: predicated region body
PF: predicated region fallthrough
CT: control target
= control target key end

     0   :  { %vm80_vm0 = vcmask 1040384   ;;  %vm81_vm1 = vcmask 1041408   ;;  %vm73_vm2 = vcmask 23552   ;;  %v3419_v1 = vmov 65535   ;;  %s4162_s2 = inlined_call_operand.vmem [shape: bf16[3,128], index: 2, kind: input, shape index: {}]   ;;  %s4163_s0 = inlined_call_operand.vmem [shape: bf16[32,3], index: 0, kind: input, shape index: {}]   ;;  %s4164_s4 = inlined_call_operand.vmem [shape: bf16[64,640], index: 4, kind: input, shape index: {}]   ;;  %s4165_s1 = inlined_call_operand.vmem [shape: bf16[2,64], index: 1, kind: input, shape index: {}]   ;;  %s4166_s10 = inlined_call_operand.vmem [shape: bf16[5,128,128], index: 10, kind: input, shape index: {}]   ;;  %s4167_s5 = inlined_call_operand.vmem [shape: f32[1,640], index: 5, kind: input, shape index: {}]   ;;  %s4168_s3 = inlined_call_operand.vmem [shape: f32[1,128], index: 3, kind: input, shape index: {}]   ;;  %s4169_s6 = inlined_call_operand.vmem [shape: f32[5,1,128], index: 6, kind: input, shape index: {}]   ;;  %s4170_s7 = inlined_call_operand.vmem [shape: f32[5,1,128], index: 7, kind: input, shape index: {}]   ;;  %s4171_s11 = inlined_call_operand.vmem [shape: bf16[5,128,128], index: 11, kind: input, shape index: {}]   ;;  %s4172_s8 = inlined_call_operand.vmem [shape: f32[5,1,128], index: 8, kind: input, shape index: {}]   ;;  %s4173_s9 = inlined_call_operand.vmem [shape: f32[5,1,128], index: 9, kind: input, shape index: {}]   ;;  %s4174_s12 = inlined_call_operand.vmem [shape: f32[5,1,128], index: 12, kind: input, shape index: {}]   ;;  %s4175_s13 = inlined_call_operand.vmem [shape: bf16[128,128], index: 13, kind: input, shape index: {}]   ;;  %s4176_s14 = inlined_call_operand.vmem [shape: f32[1,128], index: 14, kind: input, shape index: {}]   ;;  %s4177_s15 = inlined_call_operand.vmem [shape: bf16[32,128], index: 15, kind: output, shape index: {}]  }
   0x1   :  { %v55_v0 = vld [vmem:[%s4162_s2] sm:$0x3]  ;;  %v82_v2 = vsel %vm80_vm0, 4294967295, %v3419_v1  ;;  %v3268_v6 = vld [vmem:[%s4164_s4 + $0x4] ss:$20 sps:$4 sm:$0xff]   ;;  %v3420_v7 = vmov 0   ;;  %v163_v35 = vlaneseq }
   0x2   :  { %v3264_v3 = vld [vmem:[%s4163_s0] sm:$0xff]   ;;  %v83_v4 = vsel %vm81_vm1, %v82_v2, 0  ;;  %369 = vmatprep.mubr.bf16.mxu0 %v3420_v7  ;;  %v3265_v8 = vld [vmem:[%s4163_s0 + $0x8] sm:$0xff]   ;;  %v3277_v14 = vld [vmem:[%s4164_s4 + $0x7c] ss:$20 sps:$4 sm:$0xff]   ;;  %vm292_vm3 = vcmask 523264  }
   0x3   :  { %v85_v5 = vand.u32 %v83_v4, %v55_v0  ;;  %3023 = vmatprep.mubr.msk.bf16.mxu1 %vm73_vm2, %v3264_v3  ;;  %v3266_v9 = vld [vmem:[%s4164_s4] ss:$20 sps:$4 sm:$0xff]   ;;  %v3269_v11 = vld [vmem:[%s4164_s4 + $0x28] ss:$20 sps:$4 sm:$0xff]   ;;  %v3272_v13 = vld [vmem:[%s4164_s4 + $0x50] ss:$20 sps:$4 sm:$0xff]  }
   0x4   :  { %v3271_v10 = vld [vmem:[%s4164_s4 + $0x2c] ss:$20 sps:$4 sm:$0xff]   ;;  %v3274_v12 = vld [vmem:[%s4164_s4 + $0x54] ss:$20 sps:$4 sm:$0xff]   ;;  %v3283_v20 = vld [vmem:[%s4164_s4 + $0x30] ss:$20 sps:$4 sm:$0xff]  }
   0x5   :  { %3021 = vmatprep.subr.bf16.mxu1 %v85_v5  ;;  %v3275_v15 = vld [vmem:[%s4164_s4 + $0x78] ss:$20 sps:$4 sm:$0xff]   ;;  %v3542_v16 = vld [vmem:[%s4165_s1] sm:$0x1]  ;;  %v3280_v18 = vld [vmem:[%s4164_s4 + $0x8] ss:$20 sps:$4 sm:$0xff]  }
   0x6   :  { %3022 = vmatpush3.bf16.msra.mxu1 %v85_v5  ;;  %v3278_v17 = vld [vmem:[%s4164_s4 + $0xc] ss:$20 sps:$4 sm:$0xff]   ;;  %v3281_v19 = vld [vmem:[%s4164_s4 + $0x34] ss:$20 sps:$4 sm:$0xff]   ;;  %v3284_v21 = vld [vmem:[%s4164_s4 + $0x5c] ss:$20 sps:$4 sm:$0xff]  }
   0x7   :  { %296 = vmatprep.subr.bf16.mxu1 %v3268_v6  ;;  %337 = vmatprep.subr.bf16.mxu0 %v3278_v17  ;;  %v3286_v22 = vld [vmem:[%s4164_s4 + $0x58] ss:$20 sps:$4 sm:$0xff]   ;;  %v3289_v24 = vld [vmem:[%s4164_s4 + $0x80] ss:$20 sps:$4 sm:$0xff]   ;;  %v3596_v38 = vshrl.u32 %v163_v35, 7  ;;  %vm3423_vm4 = vmmov 0  }
   0x8   :  { %338 = vmatpush1.bf16.msra.mxu0 %v3280_v18  ;;  %v3287_v23 = vld [vmem:[%s4164_s4 + $0x84] ss:$20 sps:$4 sm:$0xff]   ;;  %v3291_v26 = vld [vmem:[%s4166_s10 + $0x8] sm:$0xff]   ;;  %v3292_v27 = vld [vmem:[%s4166_s10 + $0x10] sm:$0xff]   ;;  %v3421_v39 = vmov 1966171168  }
   0x9   :  { %3024 = vmatmul.mubr.msk.bf16.vlgmr.msra.gmra.mrb[0].mxu1 %vm73_vm2, %v3265_v8  ;;  %339 = vmatprep.subr.bf16.mxu0 %v3281_v19  ;;  %v3290_v25 = vld [vmem:[%s4166_s10] sm:$0xff]   ;;  %v3293_v28 = vld [vmem:[%s4166_s10 + $0x18] sm:$0xff]   ;;  %v3295_v30 = vld [vmem:[%s4166_s10 + $0x28] sm:$0xff]   ;;  %v420_v40 = vunpack.c.l.s4 %v3421_v39  ;;  %v3599_v41 = vsub.s32 0, %v3596_v38 }
   0xa   :  { %297 = vmatpush1.bf16.msra.mxu1 %v3266_v9  ;;  %328 = vmatprep.mubr.bf16.mxu1 %v3420_v7  ;;  %v3294_v29 = vld [vmem:[%s4166_s10 + $0x20] sm:$0xff]   ;;  %v3296_v31 = vld [vmem:[%s4166_s10 + $0x30] sm:$0xff]   ;;  %v3297_v32 = vld [vmem:[%s4166_s10 + $0x38] sm:$0xff]  }
   0xb   :  { %298 = vmatprep.subr.bf16.mxu1 %v3271_v10  ;;  %v3604_v42 = vld [vmem:[%s4167_s5] sm:$0x1f]  ;;  %v421_v43 = vunpack.c.0.s8 %v420_v40 }
   0xc   :  { %340 = vmatpush1.bf16.msra.mxu0 %v3283_v20  ;;  %v166_v44 = vrot.slane %v3604_v42, %v3599_v41  ;;  %v2610_v52 = vld [vmem:[%s4168_s3] ss:$0 sm:$0xff] }
   0xd   :  { %341 = vmatprep.subr.bf16.mxu0 %v3284_v21  ;;  %v3609_v45 = vsub.s32 %v421_v43, %v3596_v38 }
   0xe   :  { %299 = vmatpush1.bf16.msra.mxu1 %v3269_v11 }
   0xf   :  { %300 = vmatprep.subr.bf16.mxu1 %v3274_v12 }
  0x10   :  { %342 = vmatpush1.bf16.msra.mxu0 %v3286_v22 }
  0x11   :  { %343 = vmatprep.subr.bf16.mxu0 %v3287_v23 }
  0x12   :  { %301 = vmatpush1.bf16.msra.mxu1 %v3272_v13 }
  0x13   :  { %302 = vmatprep.subr.bf16.mxu1 %v3277_v14 }
  0x14   :  { %344 = vmatpush1.bf16.msra.mxu0 %v3289_v24 }
  0x15   :  { %3039 = vmatprep.subr.bf16.mxu0 %v3290_v25 }
  0x16   :  { %303 = vmatpush1.bf16.msra.mxu1 %v3275_v15 }
  0x17   :  { %2636 = vmatmul.mubr.msk.bf16.vlgmr.msra.gmra.mrb[0].mxu0 %vm292_vm3, %v3542_v16 }
  0x18   :  { %3040 = vmatpush3.bf16.msra.mxu0 %v3290_v25 }
  0x19   :  { %2635 = vmatmul.mubr.msk.bf16.vlgmr.msra.gmra.mrb[4].mxu1 %vm292_vm3, %v3542_v16  ;;  %3041 = vmatprep.subr.bf16.mxu0 %v3291_v26 }
  0x1c   :  { %3042 = vmatpush3.bf16.msra.mxu0 %v3291_v26 }
  0x1d   :  { %3043 = vmatprep.subr.bf16.mxu0 %v3292_v27 }
  0x20   :  { %3044 = vmatpush3.bf16.msra.mxu0 %v3292_v27 }
  0x21   :  { %3045 = vmatprep.subr.bf16.mxu0 %v3293_v28 }
  0x24   :  { %3046 = vmatpush3.bf16.msra.mxu0 %v3293_v28 }
  0x25   :  { %3047 = vmatprep.subr.bf16.mxu0 %v3294_v29 }
  0x28   :  { %3048 = vmatpush3.bf16.msra.mxu0 %v3294_v29 }
  0x29   :  { %3049 = vmatprep.subr.bf16.mxu0 %v3295_v30 }
  0x2c   :  { %3050 = vmatpush3.bf16.msra.mxu0 %v3295_v30 }
  0x2d   :  { %3051 = vmatprep.subr.bf16.mxu0 %v3296_v31 }
  0x30   :  { %3052 = vmatpush3.bf16.msra.mxu0 %v3296_v31  ;;  %v455_v31 = vld [vmem:[%s4169_s6] sm:$0x1] }
  0x31   :  { %3053 = vmatprep.subr.bf16.mxu0 %v3297_v32 }
  0x34   :  { %3054 = vmatpush3.bf16.msra.mxu0 %v3297_v32 }
  0xdc   :  { %v3025_v33 = vpop.f32.mrb[0].mxu1 }
  0xdd   :  { %v121_v34 = vpop.f32.mrb[1].mxu1  ;;  %v130_v59 = vadd.f32 %v3025_v33, %v2610_v52 }
  0xde   :  { %v3026_v36 = vpop.f32.mrb[2].mxu1  ;;  %v122_v55 = vadd.f32 %v2610_v52, %v121_v34  ;;  %v456_v34 = vld [vmem:[%s4170_s7] sm:$0x1] }
  0xdf   :  { %v124_v37 = vpop.f32.mrb[3].mxu1  ;;  %v133_v60 = vadd.f32 %v3026_v36, %v2610_v52 }
  0xe0   :  { %v125_v56 = vadd.f32 %v2610_v52, %v124_v37 }
  0xec   :  { %v330_v46 = vpop.f32.mrb[4].mxu1 }
  0xed   :  { %v331_v47 = vadd.f32 %v330_v46, %v166_v44  ;;  %v3611_v48 = vpop.f32.mrb[5].mxu1 }
  0xee   :  { %v334_v49 = vpop.f32.mrb[6].mxu1 }
  0xef   :  { %v425_v50 = vrot.slane %v331_v47, %v3609_v45  ;;  %v335_v51 = vpop.f32.mrb[7].mxu1 }
  0xf1   :  { %v426_v53 = vcombine.high %v425_v50, %v425_v50  ;;  %v433_v54 = vrot.slane %v425_v50, %v3609_v45 }
  0xf3   :  { %v440_v57 = vrot.slane %v426_v53, %v3609_v45  ;;  %v444_v58 = vrot.slane %v433_v54, %v3599_v41 }
  0xf5   :  { %v448_v61 = vrot.slane %v440_v57, %v3599_v41  ;;  %v3621_v62 = vadd.f32 %v444_v58, %v122_v55  ;;  %v3623_v63 = vadd.f32 %v444_v58, %v125_v56  ;;  %v3653_v58 = vpop.f32.mrb[0].mxu0 }
  0xf7   :  { %v3625_v0 = vadd.f32 %v448_v61, %v130_v59  ;;  %v3627_v1 = vadd.f32 %v448_v61, %v133_v60  ;;  %v457_v2 = vadd.f32 %v3623_v63, %v3621_v62  ;;  %v467_v3 = vmul.f32 %v3621_v62, %v3621_v62  ;;  %v3655_v59 = vpop.f32.mrb[1].mxu0 }
  0xf8   :  { %v468_v4 = vmul.f32 %v3623_v63, %v3623_v63  ;;  %v375_v60 = vpop.f32.mrb[2].mxu0 }
  0xf9   :  { %v458_v5 = vadd.f32 %v457_v2, %v3625_v0  ;;  %v469_v6 = vmul.f32 %v3625_v0, %v3625_v0  ;;  %v470_v9 = vmul.f32 %v3627_v1, %v3627_v1  ;;  %v376_v61 = vpop.f32.mrb[3].mxu0  ;;  %v3298_v2 = vld [vmem:[%s4164_s4 + $0x10] ss:$20 sps:$4 sm:$0xff]  }
  0xfa   :  { %v471_v7 = vadd.f32 %v468_v4, %v467_v3  ;;  %v3422_v3 = vmov 0.0   ;;  %v3299_v4 = vld [vmem:[%s4164_s4 + $0x38] ss:$20 sps:$4 sm:$0xff]  }
  0xfb   :  { %v459_v8 = vadd.f32 %v458_v5, %v3627_v1  ;;  %3027 = vmatprep.subr.bf16.mxu1 %v3422_v3  ;;  %v3300_v5 = vld [vmem:[%s4164_s4 + $0x60] ss:$20 sps:$4 sm:$0xff]   ;;  %3035 = vmatprep.mubr.msk.bf16.mxu1 %vm3423_vm4, %v3422_v3 }
  0xfc   :  { %v472_v10 = vadd.f32 %v471_v7, %v469_v6  ;;  %3028 = vmatpush3.bf16.msra.mxu1 %v3298_v2  ;;  %v3301_v6 = vld [vmem:[%s4164_s4 + $0x88] ss:$20 sps:$4 sm:$0xff]   ;;  %v3302_v7 = vld [vmem:[%s4171_s11] sm:$0xff]  }
  0xfd   :  { %v460_v11 = vrot.slane %v459_v8, 4  ;;  %3029 = vmatprep.subr.bf16.mxu1 %v3422_v3 }
  0xfe   :  { %v473_v12 = vadd.f32 %v472_v10, %v470_v9  ;;  %v3304_v9 = vld [vmem:[%s4171_s11 + $0x10] sm:$0xff]   ;;  %v3306_v10 = vld [vmem:[%s4171_s11 + $0x20] sm:$0xff]  }
  0xff   :  { %v461_v13 = vadd.f32 %v460_v11, %v459_v8  ;;  %v3303_v8 = vld [vmem:[%s4171_s11 + $0x8] sm:$0xff]  }
 0x100   :  { %v474_v14 = vrot.slane %v473_v12, 4  ;;  %3030 = vmatpush3.bf16.msra.mxu1 %v3299_v4  ;;  %v3307_v11 = vld [vmem:[%s4171_s11 + $0x28] sm:$0xff]  }
 0x101   :  { %v462_v15 = vrot.slane %v461_v13, 2  ;;  %3031 = vmatprep.subr.bf16.mxu1 %v3422_v3 }
 0x102   :  { %v475_v17 = vadd.f32 %v474_v14, %v473_v12  ;;  %v3308_v12 = vld [vmem:[%s4171_s11 + $0x30] sm:$0xff]  }
 0x103   :  { %v463_v18 = vadd.f32 %v462_v15, %v461_v13  ;;  %v3309_v13 = vld [vmem:[%s4171_s11 + $0x38] sm:$0xff]  }
 0x104   :  { %v476_v19 = vrot.slane %v475_v17, 2  ;;  %3032 = vmatpush3.bf16.msra.mxu1 %v3300_v5 }
 0x105   :  { %v464_v20 = vrot.slane %v463_v18, 1  ;;  %3033 = vmatprep.subr.bf16.mxu1 %v3422_v3 }
 0x106   :  { %v477_v21 = vadd.f32 %v476_v19, %v475_v17 }
 0x107   :  { %v465_v22 = vadd.f32 %v464_v20, %v463_v18 }
 0x108   :  { %v478_v23 = vrot.slane %v477_v21, 1  ;;  %3034 = vmatpush3.bf16.msra.mxu1 %v3301_v6 }
 0x109   :  { %v466_v24 = vmul.f32 0.03125, %v465_v22  ;;  %3059 = vmatprep.subr.bf16.mxu1 %v3302_v7 }
 0x10a   :  { %v479_v25 = vadd.f32 %v478_v23, %v477_v21 }
 0x10b   :  { %v481_v26 = vmul.f32 %v466_v24, %v466_v24  ;;  %3036 = vmatmul.mubr.msk.bf16.vlgmr.msra.gmra.mrb[8].mxu1 %vm292_vm3, %v3542_v16  ;;  %v3305_v16 = vld [vmem:[%s4171_s11 + $0x18] sm:$0xff]  }
 0x10c   :  { %v480_v27 = vmul.f32 0.03125, %v479_v25  ;;  %3060 = vmatpush3.bf16.msra.mxu1 %v3302_v7 }
 0x10d   :  { %3061 = vmatprep.subr.bf16.mxu1 %v3303_v8 }
 0x10e   :  { %v482_v28 = vsub.f32 %v480_v27, %v481_v26 }
 0x110   :  { %v483_v29 = vmax.f32 %v482_v28, 0.0  ;;  %3062 = vmatpush3.bf16.msra.mxu1 %v3303_v8 }
 0x111   :  { %3063 = vmatprep.subr.bf16.mxu1 %v3304_v9 }
 0x112   :  { %v484_v30 = vadd.f32 1e-05, %v483_v29 }
 0x114   :  { %3382 = vrsqrt.f32 %v484_v30  ;;  %3064 = vmatpush3.bf16.msra.mxu1 %v3304_v9 }
 0x115   :  { %3065 = vmatprep.subr.bf16.mxu1 %v3305_v16 }
 0x118   :  { %3066 = vmatpush3.bf16.msra.mxu1 %v3305_v16 }
 0x119   :  { %3067 = vmatprep.subr.bf16.mxu1 %v3306_v10 }
 0x11c   :  { %3068 = vmatpush3.bf16.msra.mxu1 %v3306_v10 }
 0x11d   :  { %3069 = vmatprep.subr.bf16.mxu1 %v3307_v11 }
 0x11e   :  { %v3383_v32 = vpop.eup %3382 }
 0x11f   :  { %v486_v33 = vmul.f32 %v3383_v32, %v455_v31 }
 0x120   :  { %3070 = vmatpush3.bf16.msra.mxu1 %v3307_v11 }
 0x121   :  { %v487_v35 = vmul.f32 %v486_v33, %v466_v24  ;;  %v493_v36 = vrot.slane %v486_v33, %v3599_v41  ;;  %3071 = vmatprep.subr.bf16.mxu1 %v3308_v12 }
 0x123   :  { %v488_v37 = vsub.f32 %v456_v34, %v487_v35  ;;  %v495_v39 = vmul.f32 %v493_v36, %v3621_v62  ;;  %v496_v40 = vmul.f32 %v493_v36, %v3623_v63  ;;  %v497_v44 = vmul.f32 %v493_v36, %v3625_v0 }
 0x124   :  { %v498_v46 = vmul.f32 %v493_v36, %v3627_v1  ;;  %3072 = vmatpush3.bf16.msra.mxu1 %v3308_v12 }
 0x125   :  { %v503_v43 = vrot.slane %v488_v37, %v3599_v41  ;;  %3073 = vmatprep.subr.bf16.mxu1 %v3309_v13 }
 0x127   :  { %v505_v47 = vadd.f32 %v503_v43, %v495_v39  ;;  %v506_v49 = vadd.f32 %v503_v43, %v496_v40  ;;  %v507_v50 = vadd.f32 %v503_v43, %v497_v44  ;;  %v508_v51 = vadd.f32 %v503_v43, %v498_v46 }
 0x128   :  { %3074 = vmatpush3.bf16.msra.mxu1 %v3309_v13 }
 0x129   :  { %v509_v52 = vmax.f32 %v505_v47, 0.0  ;;  %v510_v53 = vmax.f32 %v506_v49, 0.0  ;;  %v511_v54 = vmax.f32 %v507_v50, 0.0  ;;  %v512_v55 = vmax.f32 %v508_v51, 0.0 }
 0x12b   :  { %v513_v56 = vpack.c.bf16 %v510_v53, %v509_v52  ;;  %v514_v57 = vpack.c.bf16 %v512_v55, %v511_v54  ;;  %v628_v52 = vld [vmem:[%s4172_s8] sm:$0x1] }
 0x12c   :  { %v629_v55 = vld [vmem:[%s4173_s9] sm:$0x1] }
 0x12d   :  { %3055 = vmatprep.mubr.bf16.mxu0 %v513_v56 }
 0x12e   :  { %3056 = vmatmul.mubr.bf16.vlgmr.msra.gmra.mrb[4].mxu0 %v514_v57 }
 0x201   :  { %v3057_v14 = vpop.f32.mrb[4].mxu0 }
 0x202   :  { %v613_v15 = vpop.f32.mrb[5].mxu0  ;;  %v642_v22 = vmul.f32 %v3057_v14, %v3057_v14 }
 0x203   :  { %v3058_v17 = vpop.f32.mrb[6].mxu0  ;;  %v640_v19 = vmul.f32 %v613_v15, %v613_v15 }
 0x204   :  { %v616_v18 = vpop.f32.mrb[7].mxu0  ;;  %v643_v25 = vmul.f32 %v3058_v17, %v3058_v17 }
 0x205   :  { %v630_v20 = vadd.f32 %v616_v18, %v613_v15  ;;  %v641_v21 = vmul.f32 %v616_v18, %v616_v18 }
 0x207   :  { %v631_v23 = vadd.f32 %v3057_v14, %v630_v20  ;;  %v644_v24 = vadd.f32 %v641_v21, %v640_v19  ;;  %v3703_v20 = vpop.f32.mrb[8].mxu1  ;;  %v3311_v21 = vld [vmem:[%s4166_s10 + $0x48] sm:$0xff]  }
 0x209   :  { %v632_v26 = vadd.f32 %v3058_v17, %v631_v23  ;;  %v645_v27 = vadd.f32 %v644_v24, %v642_v22  ;;  %v3312_v22 = vld [vmem:[%s4166_s10 + $0x50] sm:$0xff]   ;;  %v3313_v23 = vld [vmem:[%s4166_s10 + $0x58] sm:$0xff]   ;;  %v3314_v24 = vld [vmem:[%s4166_s10 + $0x60] sm:$0xff]  }
 0x20b   :  { %v633_v28 = vrot.slane %v632_v26, 4  ;;  %v646_v29 = vadd.f32 %v645_v27, %v643_v25  ;;  %v3315_v25 = vld [vmem:[%s4166_s10 + $0x68] sm:$0xff]   ;;  %v3317_v27 = vld [vmem:[%s4166_s10 + $0x78] sm:$0xff]  }
 0x20d   :  { %v634_v30 = vadd.f32 %v633_v28, %v632_v26  ;;  %v647_v31 = vrot.slane %v646_v29, 4  ;;  %v3316_v26 = vld [vmem:[%s4166_s10 + $0x70] sm:$0xff]   ;;  %v169_v28 = vsub.s32 1, %v3596_v38 }
 0x20f   :  { %v635_v32 = vrot.slane %v634_v30, 2  ;;  %v648_v33 = vadd.f32 %v647_v31, %v646_v29  ;;  %v170_v29 = vrot.slane %v3604_v42, %v169_v28  ;;  %v2656_v28 = vld [vmem:[%s4170_s7 + $0x1] sm:$0x1] }
 0x211   :  { %v636_v34 = vadd.f32 %v635_v32, %v634_v30  ;;  %v649_v35 = vrot.slane %v648_v33, 2  ;;  %v333_v30 = vadd.f32 %v3611_v48, %v170_v29 }
 0x213   :  { %v637_v36 = vrot.slane %v636_v34, 1  ;;  %v650_v37 = vadd.f32 %v649_v35, %v648_v33  ;;  %v823_v31 = vrot.slane %v333_v30, %v3609_v45 }
 0x215   :  { %v638_v39 = vadd.f32 %v637_v36, %v636_v34  ;;  %v651_v40 = vrot.slane %v650_v37, 1  ;;  %v824_v32 = vcombine.high %v823_v31, %v823_v31  ;;  %v831_v34 = vrot.slane %v823_v31, %v3609_v45  ;;  %v2654_v36 = vld [vmem:[%s4174_s12] ss:$0 sm:$0xff] }
 0x217   :  { %v639_v43 = vmul.f32 0.03125, %v638_v39  ;;  %v652_v44 = vadd.f32 %v651_v40, %v650_v37  ;;  %v838_v33 = vrot.slane %v824_v32, %v3609_v45 }
 0x219   :  { %v653_v46 = vmul.f32 0.03125, %v652_v44  ;;  %v654_v47 = vmul.f32 %v639_v43, %v639_v43  ;;  %v846_v48 = vrot.slane %v838_v33, %v3599_v41 }
 0x21b   :  { %v655_v49 = vsub.f32 %v653_v46, %v654_v47 }
 0x21d   :  { %v656_v50 = vmax.f32 %v655_v49, 0.0 }
 0x21f   :  { %v657_v51 = vadd.f32 1e-05, %v656_v50  ;;  %v842_v50 = vrot.slane %v831_v34, %v3599_v41 }
 0x221   :  { %3384 = vrsqrt.f32 %v657_v51 }
 0x22b   :  { %v3385_v53 = vpop.eup %3384 }
 0x22c   :  { %v659_v54 = vmul.f32 %v3385_v53, %v628_v52 }
 0x22e   :  { %v660_v56 = vmul.f32 %v659_v54, %v639_v43  ;;  %v666_v57 = vrot.slane %v659_v54, %v3599_v41 }
 0x230   :  { %v661_v60 = vsub.f32 %v629_v55, %v660_v56  ;;  %v669_v61 = vmul.f32 %v666_v57, %v616_v18  ;;  %v668_v2 = vmul.f32 %v666_v57, %v613_v15  ;;  %v670_v3 = vmul.f32 %v3057_v14, %v666_v57  ;;  %v3037_v18 = vpop.f32.mrb[9].mxu1 }
 0x231   :  { %v671_v4 = vmul.f32 %v3058_v17, %v666_v57  ;;  %v415_v15 = vpop.f32.mrb[10].mxu1  ;;  %v3310_v17 = vld [vmem:[%s4166_s10 + $0x40] sm:$0xff]  }
 0x232   :  { %v676_v5 = vrot.slane %v661_v60, %v3599_v41  ;;  %v3038_v14 = vpop.f32.mrb[11].mxu1  ;;  %3079 = vmatprep.subr.bf16.mxu0 %v3310_v17 }
 0x233   :  { %3080 = vmatpush3.bf16.msra.mxu0 %v3310_v17 }
 0x234   :  { %v679_v6 = vadd.f32 %v676_v5, %v669_v61  ;;  %v678_v7 = vadd.f32 %v676_v5, %v668_v2  ;;  %v680_v8 = vadd.f32 %v676_v5, %v670_v3  ;;  %v681_v9 = vadd.f32 %v676_v5, %v671_v4  ;;  %3081 = vmatprep.subr.bf16.mxu0 %v3311_v21 }
 0x236   :  { %v682_v16 = vmax.f32 %v678_v7, 0.0  ;;  %v683_v10 = vmax.f32 %v679_v6, 0.0  ;;  %v684_v11 = vmax.f32 %v680_v8, 0.0  ;;  %v685_v12 = vmax.f32 %v681_v9, 0.0 }
 0x237   :  { %3082 = vmatpush3.bf16.msra.mxu0 %v3311_v21 }
 0x238   :  { %v686_v13 = vpack.c.bf16 %v683_v10, %v682_v16  ;;  %v687_v19 = vpack.c.bf16 %v685_v12, %v684_v11  ;;  %3083 = vmatprep.subr.bf16.mxu0 %v3312_v22 }
 0x23a   :  { %3075 = vmatprep.mubr.bf16.mxu1 %v686_v13 }
 0x23b   :  { %3076 = vmatmul.mubr.bf16.vlgmr.msra.gmra.mrb[12].mxu1 %v687_v19  ;;  %3084 = vmatpush3.bf16.msra.mxu0 %v3312_v22 }
 0x23c   :  { %3085 = vmatprep.subr.bf16.mxu0 %v3313_v23 }
 0x23f   :  { %3086 = vmatpush3.bf16.msra.mxu0 %v3313_v23 }
 0x240   :  { %3087 = vmatprep.subr.bf16.mxu0 %v3314_v24 }
 0x243   :  { %3088 = vmatpush3.bf16.msra.mxu0 %v3314_v24 }
 0x244   :  { %3089 = vmatprep.subr.bf16.mxu0 %v3315_v25 }
 0x247   :  { %3090 = vmatpush3.bf16.msra.mxu0 %v3315_v25  ;;  %v2655_v25 = vld [vmem:[%s4169_s6 + $0x1] sm:$0x1] }
 0x248   :  { %3091 = vmatprep.subr.bf16.mxu0 %v3316_v26 }
 0x24b   :  { %3092 = vmatpush3.bf16.msra.mxu0 %v3316_v26 }
 0x24c   :  { %3093 = vmatprep.subr.bf16.mxu0 %v3317_v27 }
 0x24f   :  { %3094 = vmatpush3.bf16.msra.mxu0 %v3317_v27 }
 0x30e   :  { %v3077_v35 = vpop.f32.mrb[12].mxu1 }
 0x30f   :  { %v803_v37 = vadd.f32 %v3077_v35, %v3625_v0  ;;  %v786_v39 = vpop.f32.mrb[13].mxu1 }
 0x310   :  { %v801_v40 = vadd.f32 %v786_v39, %v3621_v62  ;;  %v3078_v43 = vpop.f32.mrb[14].mxu1 }
 0x311   :  { %v814_v44 = vadd.f32 %v2654_v36, %v803_v37  ;;  %v804_v46 = vadd.f32 %v3078_v43, %v3627_v1  ;;  %v789_v47 = vpop.f32.mrb[15].mxu1 }
 0x312   :  { %v812_v49 = vadd.f32 %v2654_v36, %v801_v40  ;;  %v802_v51 = vadd.f32 %v789_v47, %v3623_v63 }
 0x313   :  { %v3744_v52 = vadd.f32 %v846_v48, %v814_v44  ;;  %v815_v53 = vadd.f32 %v2654_v36, %v804_v46 }
 0x314   :  { %v3746_v54 = vadd.f32 %v842_v50, %v812_v49  ;;  %v813_v0 = vadd.f32 %v2654_v36, %v802_v51  ;;  %v3318_v51 = vld [vmem:[%s4171_s11 + $0x40] sm:$0xff]  }
 0x315   :  { %v3748_v55 = vadd.f32 %v846_v48, %v815_v53  ;;  %v869_v63 = vmul.f32 %v3744_v52, %v3744_v52  ;;  %3099 = vmatprep.subr.bf16.mxu1 %v3318_v51  ;;  %v3319_v53 = vld [vmem:[%s4171_s11 + $0x48] sm:$0xff]  }
 0x316   :  { %v3750_v62 = vadd.f32 %v842_v50, %v813_v0  ;;  %v867_v56 = vmul.f32 %v3746_v54, %v3746_v54  ;;  %3100 = vmatpush3.bf16.msra.mxu1 %v3318_v51  ;;  %v3320_v0 = vld [vmem:[%s4171_s11 + $0x50] sm:$0xff]  }
 0x317   :  { %v870_v2 = vmul.f32 %v3748_v55, %v3748_v55  ;;  %3101 = vmatprep.subr.bf16.mxu1 %v3319_v53 }
 0x318   :  { %v857_v1 = vadd.f32 %v3750_v62, %v3746_v54  ;;  %v868_v57 = vmul.f32 %v3750_v62, %v3750_v62 }
 0x31a   :  { %v858_v60 = vadd.f32 %v857_v1, %v3744_v52  ;;  %v871_v61 = vadd.f32 %v868_v57, %v867_v56  ;;  %3102 = vmatpush3.bf16.msra.mxu1 %v3319_v53  ;;  %v3321_v56 = vld [vmem:[%s4171_s11 + $0x58] sm:$0xff]   ;;  %v3322_v1 = vld [vmem:[%s4171_s11 + $0x60] sm:$0xff]   ;;  %v3323_v57 = vld [vmem:[%s4171_s11 + $0x68] sm:$0xff]  }
 0x31b   :  { %3103 = vmatprep.subr.bf16.mxu1 %v3320_v0 }
 0x31c   :  { %v859_v3 = vadd.f32 %v858_v60, %v3748_v55  ;;  %v872_v4 = vadd.f32 %v871_v61, %v869_v63  ;;  %v3324_v63 = vld [vmem:[%s4171_s11 + $0x70] sm:$0xff]   ;;  %v3325_v60 = vld [vmem:[%s4171_s11 + $0x78] sm:$0xff]  }
 0x31e   :  { %v860_v5 = vrot.slane %v859_v3, 4  ;;  %v873_v6 = vadd.f32 %v872_v4, %v870_v2  ;;  %3104 = vmatpush3.bf16.msra.mxu1 %v3320_v0 }
 0x31f   :  { %3105 = vmatprep.subr.bf16.mxu1 %v3321_v56 }
 0x320   :  { %v861_v7 = vadd.f32 %v860_v5, %v859_v3  ;;  %v874_v8 = vrot.slane %v873_v6, 4 }
 0x322   :  { %v862_v9 = vrot.slane %v861_v7, 2  ;;  %v875_v16 = vadd.f32 %v874_v8, %v873_v6  ;;  %3106 = vmatpush3.bf16.msra.mxu1 %v3321_v56 }
 0x323   :  { %3107 = vmatprep.subr.bf16.mxu1 %v3322_v1 }
 0x324   :  { %v863_v10 = vadd.f32 %v862_v9, %v861_v7  ;;  %v876_v11 = vrot.slane %v875_v16, 2 }
 0x326   :  { %v864_v12 = vrot.slane %v863_v10, 1  ;;  %v877_v13 = vadd.f32 %v876_v11, %v875_v16  ;;  %3108 = vmatpush3.bf16.msra.mxu1 %v3322_v1 }
 0x327   :  { %3109 = vmatprep.subr.bf16.mxu1 %v3323_v57 }
 0x328   :  { %v878_v19 = vrot.slane %v877_v13, 1  ;;  %v865_v18 = vadd.f32 %v864_v12, %v863_v10 }
 0x32a   :  { %v879_v15 = vadd.f32 %v878_v19, %v877_v13  ;;  %v866_v14 = vmul.f32 0.03125, %v865_v18  ;;  %3110 = vmatpush3.bf16.msra.mxu1 %v3323_v57 }
 0x32b   :  { %3111 = vmatprep.subr.bf16.mxu1 %v3324_v63 }
 0x32c   :  { %v880_v17 = vmul.f32 0.03125, %v879_v15  ;;  %v881_v21 = vmul.f32 %v866_v14, %v866_v14 }
 0x32e   :  { %v882_v22 = vsub.f32 %v880_v17, %v881_v21  ;;  %3112 = vmatpush3.bf16.msra.mxu1 %v3324_v63 }
 0x32f   :  { %3113 = vmatprep.subr.bf16.mxu1 %v3325_v60 }
 0x330   :  { %v883_v23 = vmax.f32 %v882_v22, 0.0 }
 0x332   :  { %v884_v24 = vadd.f32 1e-05, %v883_v23  ;;  %3114 = vmatpush3.bf16.msra.mxu1 %v3325_v60 }
 0x334   :  { %3386 = vrsqrt.f32 %v884_v24 }
 0x33e   :  { %v3387_v26 = vpop.eup %3386 }
 0x33f   :  { %v886_v27 = vmul.f32 %v3387_v26, %v2655_v25 }
 0x341   :  { %v887_v29 = vmul.f32 %v886_v27, %v866_v14  ;;  %v893_v30 = vrot.slane %v886_v27, %v3599_v41 }
 0x343   :  { %v888_v31 = vsub.f32 %v2656_v28, %v887_v29  ;;  %v895_v32 = vmul.f32 %v893_v30, %v3746_v54  ;;  %v896_v33 = vmul.f32 %v893_v30, %v3750_v62  ;;  %v897_v35 = vmul.f32 %v893_v30, %v3744_v52 }
 0x344   :  { %v898_v36 = vmul.f32 %v893_v30, %v3748_v55 }
 0x345   :  { %v903_v34 = vrot.slane %v888_v31, %v3599_v41 }
 0x347   :  { %v905_v37 = vadd.f32 %v903_v34, %v895_v32  ;;  %v906_v39 = vadd.f32 %v903_v34, %v896_v33  ;;  %v907_v40 = vadd.f32 %v903_v34, %v897_v35  ;;  %v908_v43 = vadd.f32 %v903_v34, %v898_v36  ;;  %v2681_v34 = vld [vmem:[%s4172_s8 + $0x1] sm:$0x1] }
 0x349   :  { %v909_v44 = vmax.f32 %v905_v37, 0.0  ;;  %v910_v48 = vmax.f32 %v906_v39, 0.0  ;;  %v911_v46 = vmax.f32 %v907_v40, 0.0  ;;  %v912_v47 = vmax.f32 %v908_v43, 0.0  ;;  %v2682_v37 = vld [vmem:[%s4173_s9 + $0x1] sm:$0x1] }
 0x34b   :  { %v913_v49 = vpack.c.bf16 %v910_v48, %v909_v44  ;;  %v914_v50 = vpack.c.bf16 %v912_v47, %v911_v46 }
 0x34d   :  { %3095 = vmatprep.mubr.bf16.mxu0 %v913_v49 }
 0x34e   :  { %3096 = vmatmul.mubr.bf16.vlgmr.msra.gmra.mrb[8].mxu0 %v914_v50 }
 0x421   :  { %v3097_v61 = vpop.f32.mrb[8].mxu0 }
 0x422   :  { %v1014_v2 = vpop.f32.mrb[9].mxu0  ;;  %v1045_v8 = vmul.f32 %v3097_v61, %v3097_v61 }
 0x423   :  { %v3098_v3 = vpop.f32.mrb[10].mxu0  ;;  %v1043_v5 = vmul.f32 %v1014_v2, %v1014_v2 }
 0x424   :  { %v1017_v4 = vpop.f32.mrb[11].mxu0  ;;  %v1046_v10 = vmul.f32 %v3098_v3, %v3098_v3 }
 0x425   :  { %v1033_v6 = vadd.f32 %v1017_v4, %v1014_v2  ;;  %v1044_v7 = vmul.f32 %v1017_v4, %v1017_v4 }
 0x427   :  { %v1034_v9 = vadd.f32 %v3097_v61, %v1033_v6  ;;  %v1047_v16 = vadd.f32 %v1044_v7, %v1043_v5  ;;  %v3330_v6 = vld [vmem:[%s4166_s10 + $0xa0] sm:$0xff]   ;;  %v3331_v7 = vld [vmem:[%s4166_s10 + $0xa8] sm:$0xff]  }
 0x429   :  { %v1035_v11 = vadd.f32 %v3098_v3, %v1034_v9  ;;  %v1048_v12 = vadd.f32 %v1047_v16, %v1045_v8  ;;  %v3332_v8 = vld [vmem:[%s4166_s10 + $0xb0] sm:$0xff]   ;;  %v3333_v9 = vld [vmem:[%s4166_s10 + $0xb8] sm:$0xff]   ;;  %v173_v16 = vsub.s32 2, %v3596_v38 }
 0x42b   :  { %v1036_v13 = vrot.slane %v1035_v11, 4  ;;  %v1049_v19 = vadd.f32 %v1048_v12, %v1046_v10  ;;  %v174_v10 = vrot.slane %v3604_v42, %v173_v16 }
 0x42d   :  { %v1037_v18 = vadd.f32 %v1036_v13, %v1035_v11  ;;  %v1050_v15 = vrot.slane %v1049_v19, 4  ;;  %v372_v11 = vadd.f32 %v3653_v58, %v174_v10 }
 0x42f   :  { %v1038_v14 = vrot.slane %v1037_v18, 2  ;;  %v1051_v17 = vadd.f32 %v1050_v15, %v1049_v19  ;;  %v1228_v12 = vrot.slane %v372_v11, %v3609_v45 }
 0x431   :  { %v1039_v21 = vadd.f32 %v1038_v14, %v1037_v18  ;;  %v1052_v22 = vrot.slane %v1051_v17, 2  ;;  %v1229_v13 = vcombine.high %v1228_v12, %v1228_v12  ;;  %v1236_v18 = vrot.slane %v1228_v12, %v3609_v45  ;;  %v2708_v14 = vld [vmem:[%s4174_s12 + $0x1] ss:$0 sm:$0xff] }
 0x433   :  { %v1040_v23 = vrot.slane %v1039_v21, 1  ;;  %v1053_v24 = vadd.f32 %v1052_v22, %v1051_v17  ;;  %v1243_v19 = vrot.slane %v1229_v13, %v3609_v45 }
 0x435   :  { %v1041_v25 = vadd.f32 %v1040_v23, %v1039_v21  ;;  %v1054_v26 = vrot.slane %v1053_v24, 1  ;;  %v1251_v58 = vrot.slane %v1243_v19, %v3599_v41 }
 0x437   :  { %v1042_v27 = vmul.f32 0.03125, %v1041_v25  ;;  %v1055_v28 = vadd.f32 %v1054_v26, %v1053_v24 }
 0x439   :  { %v1056_v29 = vmul.f32 0.03125, %v1055_v28  ;;  %v1057_v30 = vmul.f32 %v1042_v27, %v1042_v27 }
 0x43b   :  { %v1058_v31 = vsub.f32 %v1056_v29, %v1057_v30 }
 0x43d   :  { %v1059_v32 = vmax.f32 %v1058_v31, 0.0 }
 0x43f   :  { %v1060_v33 = vadd.f32 1e-05, %v1059_v32 }
 0x441   :  { %3388 = vrsqrt.f32 %v1060_v33 }
 0x44b   :  { %v3389_v35 = vpop.eup %3388 }
 0x44c   :  { %v1062_v36 = vmul.f32 %v3389_v35, %v2681_v34 }
 0x44e   :  { %v1063_v39 = vmul.f32 %v1062_v36, %v1042_v27  ;;  %v1069_v40 = vrot.slane %v1062_v36, %v3599_v41  ;;  %v1247_v27 = vrot.slane %v1236_v18, %v3599_v41 }
 0x450   :  { %v1064_v43 = vsub.f32 %v2682_v37, %v1063_v39  ;;  %v1072_v44 = vmul.f32 %v1069_v40, %v1017_v4  ;;  %v1071_v48 = vmul.f32 %v1069_v40, %v1014_v2  ;;  %v1073_v46 = vmul.f32 %v3097_v61, %v1069_v40  ;;  %v3326_v2 = vld [vmem:[%s4166_s10 + $0x80] sm:$0xff]   ;;  %v3327_v61 = vld [vmem:[%s4166_s10 + $0x88] sm:$0xff]   ;;  %v3329_v4 = vld [vmem:[%s4166_s10 + $0x98] sm:$0xff]  }
 0x451   :  { %v1074_v47 = vmul.f32 %v3098_v3, %v1069_v40  ;;  %3119 = vmatprep.subr.bf16.mxu0 %v3326_v2  ;;  %v3328_v3 = vld [vmem:[%s4166_s10 + $0x90] sm:$0xff]  }
 0x452   :  { %v1079_v49 = vrot.slane %v1064_v43, %v3599_v41  ;;  %3120 = vmatpush3.bf16.msra.mxu0 %v3326_v2 }
 0x453   :  { %3121 = vmatprep.subr.bf16.mxu0 %v3327_v61 }
 0x454   :  { %v1082_v50 = vadd.f32 %v1079_v49, %v1072_v44  ;;  %v1081_v51 = vadd.f32 %v1079_v49, %v1071_v48  ;;  %v1083_v53 = vadd.f32 %v1079_v49, %v1073_v46  ;;  %v1084_v0 = vadd.f32 %v1079_v49, %v1074_v47 }
 0x456   :  { %v1085_v56 = vmax.f32 %v1081_v51, 0.0  ;;  %v1086_v1 = vmax.f32 %v1082_v50, 0.0  ;;  %v1087_v57 = vmax.f32 %v1083_v53, 0.0  ;;  %v1088_v63 = vmax.f32 %v1084_v0, 0.0  ;;  %3122 = vmatpush3.bf16.msra.mxu0 %v3327_v61 }
 0x457   :  { %3123 = vmatprep.subr.bf16.mxu0 %v3328_v3 }
 0x458   :  { %v1089_v60 = vpack.c.bf16 %v1086_v1, %v1085_v56  ;;  %v1090_v5 = vpack.c.bf16 %v1088_v63, %v1087_v57 }
 0x45a   :  { %3115 = vmatprep.mubr.bf16.mxu1 %v1089_v60  ;;  %3124 = vmatpush3.bf16.msra.mxu0 %v3328_v3 }
 0x45b   :  { %3116 = vmatmul.mubr.bf16.vlgmr.msra.gmra.mrb[16].mxu1 %v1090_v5  ;;  %3125 = vmatprep.subr.bf16.mxu0 %v3329_v4 }
 0x45e   :  { %3126 = vmatpush3.bf16.msra.mxu0 %v3329_v4  ;;  %v2709_v4 = vld [vmem:[%s4169_s6 + $0x2] sm:$0x1] }
 0x45f   :  { %3127 = vmatprep.subr.bf16.mxu0 %v3330_v6 }
 0x462   :  { %3128 = vmatpush3.bf16.msra.mxu0 %v3330_v6 }
 0x463   :  { %3129 = vmatprep.subr.bf16.mxu0 %v3331_v7 }
 0x466   :  { %3130 = vmatpush3.bf16.msra.mxu0 %v3331_v7 }
 0x467   :  { %3131 = vmatprep.subr.bf16.mxu0 %v3332_v8 }
 0x46a   :  { %3132 = vmatpush3.bf16.msra.mxu0 %v3332_v8  ;;  %v2710_v8 = vld [vmem:[%s4170_s7 + $0x2] sm:$0x1] }
 0x46b   :  { %3133 = vmatprep.subr.bf16.mxu0 %v3333_v9 }
 0x46e   :  { %3134 = vmatpush3.bf16.msra.mxu0 %v3333_v9 }
 0x52e   :  { %v3117_v15 = vpop.f32.mrb[16].mxu1 }
 0x52f   :  { %v1207_v17 = vadd.f32 %v3117_v15, %v3744_v52  ;;  %v1190_v21 = vpop.f32.mrb[17].mxu1 }
 0x530   :  { %v1205_v22 = vadd.f32 %v1190_v21, %v3746_v54  ;;  %v3118_v42 = vpop.f32.mrb[18].mxu1 }
 0x531   :  { %v1219_v23 = vadd.f32 %v2708_v14, %v1207_v17  ;;  %v1208_v24 = vadd.f32 %v3118_v42, %v3748_v55  ;;  %v1193_v25 = vpop.f32.mrb[19].mxu1 }
 0x532   :  { %v1217_v26 = vadd.f32 %v2708_v14, %v1205_v22  ;;  %v1206_v28 = vadd.f32 %v1193_v25, %v3750_v62 }
 0x533   :  { %v3847_v29 = vadd.f32 %v1251_v58, %v1219_v23  ;;  %v1220_v30 = vadd.f32 %v2708_v14, %v1208_v24 }
 0x534   :  { %v3849_v31 = vadd.f32 %v1247_v27, %v1217_v26  ;;  %v1218_v52 = vadd.f32 %v2708_v14, %v1206_v28  ;;  %v3334_v26 = vld [vmem:[%s4171_s11 + $0x80] sm:$0xff]   ;;  %v3336_v28 = vld [vmem:[%s4171_s11 + $0x90] sm:$0xff]  }
 0x535   :  { %v3851_v32 = vadd.f32 %v1251_v58, %v1220_v30  ;;  %v1274_v62 = vmul.f32 %v3847_v29, %v3847_v29  ;;  %3139 = vmatprep.subr.bf16.mxu1 %v3334_v26  ;;  %v3337_v30 = vld [vmem:[%s4171_s11 + $0x98] sm:$0xff]  }
 0x536   :  { %v3853_v54 = vadd.f32 %v1247_v27, %v1218_v52  ;;  %v1272_v33 = vmul.f32 %v3849_v31, %v3849_v31  ;;  %3140 = vmatpush3.bf16.msra.mxu1 %v3334_v26  ;;  %v3335_v27 = vld [vmem:[%s4171_s11 + $0x88] sm:$0xff]   ;;  %v3338_v52 = vld [vmem:[%s4171_s11 + $0xa0] sm:$0xff]  }
 0x537   :  { %v1275_v37 = vmul.f32 %v3851_v32, %v3851_v32  ;;  %3141 = vmatprep.subr.bf16.mxu1 %v3335_v27 }
 0x538   :  { %v1262_v55 = vadd.f32 %v3853_v54, %v3849_v31  ;;  %v1273_v34 = vmul.f32 %v3853_v54, %v3853_v54 }
 0x53a   :  { %v1263_v35 = vadd.f32 %v1262_v55, %v3847_v29  ;;  %v1276_v36 = vadd.f32 %v1273_v34, %v1272_v33  ;;  %3142 = vmatpush3.bf16.msra.mxu1 %v3335_v27  ;;  %v3339_v33 = vld [vmem:[%s4171_s11 + $0xa8] sm:$0xff]   ;;  %v3340_v55 = vld [vmem:[%s4171_s11 + $0xb0] sm:$0xff]   ;;  %v3341_v34 = vld [vmem:[%s4171_s11 + $0xb8] sm:$0xff]  }
 0x53b   :  { %3143 = vmatprep.subr.bf16.mxu1 %v3336_v28 }
 0x53c   :  { %v1264_v39 = vadd.f32 %v1263_v35, %v3851_v32  ;;  %v1277_v40 = vadd.f32 %v1276_v36, %v1274_v62 }
 0x53e   :  { %v1265_v43 = vrot.slane %v1264_v39, 4  ;;  %v1278_v44 = vadd.f32 %v1277_v40, %v1275_v37  ;;  %3144 = vmatpush3.bf16.msra.mxu1 %v3336_v28 }
 0x53f   :  { %3145 = vmatprep.subr.bf16.mxu1 %v3337_v30 }
 0x540   :  { %v1266_v48 = vadd.f32 %v1265_v43, %v1264_v39  ;;  %v1279_v46 = vrot.slane %v1278_v44, 4 }
 0x542   :  { %v1267_v47 = vrot.slane %v1266_v48, 2  ;;  %v1280_v49 = vadd.f32 %v1279_v46, %v1278_v44  ;;  %3146 = vmatpush3.bf16.msra.mxu1 %v3337_v30 }
 0x543   :  { %3147 = vmatprep.subr.bf16.mxu1 %v3338_v52 }
 0x544   :  { %v1268_v50 = vadd.f32 %v1267_v47, %v1266_v48  ;;  %v1281_v51 = vrot.slane %v1280_v49, 2 }
 0x546   :  { %v1269_v53 = vrot.slane %v1268_v50, 1  ;;  %v1282_v0 = vadd.f32 %v1281_v51, %v1280_v49  ;;  %3148 = vmatpush3.bf16.msra.mxu1 %v3338_v52 }
 0x547   :  { %3149 = vmatprep.subr.bf16.mxu1 %v3339_v33 }
 0x548   :  { %v1283_v56 = vrot.slane %v1282_v0, 1  ;;  %v1270_v1 = vadd.f32 %v1269_v53, %v1268_v50 }
 0x54a   :  { %v1284_v57 = vadd.f32 %v1283_v56, %v1282_v0  ;;  %v1271_v63 = vmul.f32 0.03125, %v1270_v1  ;;  %3150 = vmatpush3.bf16.msra.mxu1 %v3339_v33 }
 0x54b   :  { %3151 = vmatprep.subr.bf16.mxu1 %v3340_v55 }
 0x54c   :  { %v1285_v60 = vmul.f32 0.03125, %v1284_v57  ;;  %v1286_v5 = vmul.f32 %v1271_v63, %v1271_v63 }
 0x54e   :  { %v1287_v2 = vsub.f32 %v1285_v60, %v1286_v5  ;;  %3152 = vmatpush3.bf16.msra.mxu1 %v3340_v55 }
 0x54f   :  { %3153 = vmatprep.subr.bf16.mxu1 %v3341_v34 }
 0x550   :  { %v1288_v61 = vmax.f32 %v1287_v2, 0.0 }
 0x552   :  { %v1289_v3 = vadd.f32 1e-05, %v1288_v61  ;;  %3154 = vmatpush3.bf16.msra.mxu1 %v3341_v34  ;;  %v3342_v34 = vld [vmem:[%s4166_s10 + $0xc0] sm:$0xff]  }
 0x553   :  { %3159 = vmatprep.subr.bf16.mxu0 %v3342_v34 }
 0x554   :  { %3390 = vrsqrt.f32 %v1289_v3 }
 0x55e   :  { %v3391_v6 = vpop.eup %3390 }
 0x55f   :  { %v1291_v7 = vmul.f32 %v3391_v6, %v2709_v4 }
 0x561   :  { %v1292_v9 = vmul.f32 %v1291_v7, %v1271_v63  ;;  %v1298_v16 = vrot.slane %v1291_v7, %v3599_v41 }
 0x563   :  { %v1293_v10 = vsub.f32 %v2710_v8, %v1292_v9  ;;  %v1300_v11 = vmul.f32 %v1298_v16, %v3849_v31  ;;  %v1301_v12 = vmul.f32 %v1298_v16, %v3853_v54  ;;  %v1302_v19 = vmul.f32 %v1298_v16, %v3847_v29 }
 0x564   :  { %v1303_v18 = vmul.f32 %v1298_v16, %v3851_v32 }
 0x565   :  { %v1308_v13 = vrot.slane %v1293_v10, %v3599_v41 }
 0x567   :  { %v1310_v15 = vadd.f32 %v1308_v13, %v1300_v11  ;;  %v1311_v14 = vadd.f32 %v1308_v13, %v1301_v12  ;;  %v1312_v17 = vadd.f32 %v1308_v13, %v1302_v19  ;;  %v1313_v21 = vadd.f32 %v1308_v13, %v1303_v18  ;;  %v2735_v11 = vld [vmem:[%s4172_s8 + $0x2] sm:$0x1] }
 0x568   :  { %v2736_v19 = vld [vmem:[%s4173_s9 + $0x2] sm:$0x1] }
 0x569   :  { %v1314_v22 = vmax.f32 %v1310_v15, 0.0  ;;  %v1315_v42 = vmax.f32 %v1311_v14, 0.0  ;;  %v1316_v23 = vmax.f32 %v1312_v17, 0.0  ;;  %v1317_v58 = vmax.f32 %v1313_v21, 0.0 }
 0x56b   :  { %v1318_v24 = vpack.c.bf16 %v1315_v42, %v1314_v22  ;;  %v1319_v25 = vpack.c.bf16 %v1317_v58, %v1316_v23 }
 0x56d   :  { %3135 = vmatprep.mubr.bf16.mxu0 %v1318_v24 }
 0x56e   :  { %3136 = vmatmul.mubr.bf16.vlgmr.msra.gmra.mrb[12].mxu0 %v1319_v25 }
 0x56f   :  { %3160 = vmatpush3.bf16.msra.mxu0 %v3342_v34 }
 0x641   :  { %v3137_v62 = vpop.f32.mrb[12].mxu0 }
 0x642   :  { %v1419_v35 = vpop.f32.mrb[13].mxu0  ;;  %v1450_v44 = vmul.f32 %v3137_v62, %v3137_v62 }
 0x643   :  { %v3138_v36 = vpop.f32.mrb[14].mxu0  ;;  %v1448_v39 = vmul.f32 %v1419_v35, %v1419_v35 }
 0x644   :  { %v1422_v37 = vpop.f32.mrb[15].mxu0  ;;  %v1451_v47 = vmul.f32 %v3138_v36, %v3138_v36 }
 0x645   :  { %v1438_v40 = vadd.f32 %v1422_v37, %v1419_v35  ;;  %v1449_v43 = vmul.f32 %v1422_v37, %v1422_v37 }
 0x647   :  { %v1439_v48 = vadd.f32 %v3137_v62, %v1438_v40  ;;  %v1452_v46 = vadd.f32 %v1449_v43, %v1448_v39  ;;  %v3347_v39 = vld [vmem:[%s4166_s10 + $0xe8] sm:$0xff]   ;;  %v3348_v40 = vld [vmem:[%s4166_s10 + $0xf0] sm:$0xff]   ;;  %v3349_v43 = vld [vmem:[%s4166_s10 + $0xf8] sm:$0xff]  }
 0x649   :  { %v1440_v49 = vadd.f32 %v3138_v36, %v1439_v48  ;;  %v1453_v50 = vadd.f32 %v1452_v46, %v1450_v44  ;;  %v177_v44 = vsub.s32 3, %v3596_v38  ;;  %v3939_v48 = vld [vmem:[%s4167_s5] sm:$0x1f] }
 0x64b   :  { %v1441_v51 = vrot.slane %v1440_v49, 4  ;;  %v1454_v53 = vadd.f32 %v1453_v50, %v1451_v47  ;;  %v178_v46 = vrot.slane %v3939_v48, %v177_v44 }
 0x64d   :  { %v1442_v0 = vadd.f32 %v1441_v51, %v1440_v49  ;;  %v1455_v56 = vrot.slane %v1454_v53, 4  ;;  %v374_v47 = vadd.f32 %v3655_v59, %v178_v46 }
 0x64f   :  { %v1443_v1 = vrot.slane %v1442_v0, 2  ;;  %v1456_v57 = vadd.f32 %v1455_v56, %v1454_v53  ;;  %v1633_v49 = vrot.slane %v374_v47, %v3609_v45  ;;  %v2762_v56 = vld [vmem:[%s4174_s12 + $0x2] ss:$0 sm:$0xff] }
 0x651   :  { %v1444_v63 = vadd.f32 %v1443_v1, %v1442_v0  ;;  %v1457_v60 = vrot.slane %v1456_v57, 2  ;;  %v1634_v50 = vcombine.high %v1633_v49, %v1633_v49  ;;  %v1641_v53 = vrot.slane %v1633_v49, %v3609_v45 }
 0x653   :  { %v1445_v5 = vrot.slane %v1444_v63, 1  ;;  %v1458_v2 = vadd.f32 %v1457_v60, %v1456_v57  ;;  %v1648_v51 = vrot.slane %v1634_v50, %v3609_v45 }
 0x655   :  { %v1446_v61 = vadd.f32 %v1445_v5, %v1444_v63  ;;  %v1459_v3 = vrot.slane %v1458_v2, 1  ;;  %v1656_v59 = vrot.slane %v1648_v51, %v3599_v41 }
 0x657   :  { %v1447_v4 = vmul.f32 0.03125, %v1446_v61  ;;  %v1460_v6 = vadd.f32 %v1459_v3, %v1458_v2 }
 0x659   :  { %v1461_v7 = vmul.f32 0.03125, %v1460_v6  ;;  %v1462_v8 = vmul.f32 %v1447_v4, %v1447_v4 }
 0x65b   :  { %v1463_v9 = vsub.f32 %v1461_v7, %v1462_v8 }
 0x65d   :  { %v1464_v16 = vmax.f32 %v1463_v9, 0.0 }
 0x65f   :  { %v1465_v10 = vadd.f32 1e-05, %v1464_v16 }
 0x661   :  { %3392 = vrsqrt.f32 %v1465_v10 }
 0x66b   :  { %v3393_v12 = vpop.eup %3392 }
 0x66c   :  { %v1467_v13 = vmul.f32 %v3393_v12, %v2735_v11 }
 0x66e   :  { %v1468_v18 = vmul.f32 %v1467_v13, %v1447_v4  ;;  %v1474_v15 = vrot.slane %v1467_v13, %v3599_v41  ;;  %v1652_v4 = vrot.slane %v1641_v53, %v3599_v41 }
 0x670   :  { %v1469_v14 = vsub.f32 %v2736_v19, %v1468_v18  ;;  %v1477_v17 = vmul.f32 %v1474_v15, %v1422_v37  ;;  %v1476_v21 = vmul.f32 %v1474_v15, %v1419_v35  ;;  %v1478_v22 = vmul.f32 %v3137_v62, %v1474_v15  ;;  %v3343_v62 = vld [vmem:[%s4166_s10 + $0xc8] sm:$0xff]   ;;  %v3344_v35 = vld [vmem:[%s4166_s10 + $0xd0] sm:$0xff]   ;;  %v3346_v37 = vld [vmem:[%s4166_s10 + $0xe0] sm:$0xff]  }
 0x671   :  { %v1479_v42 = vmul.f32 %v3138_v36, %v1474_v15  ;;  %3161 = vmatprep.subr.bf16.mxu0 %v3343_v62  ;;  %v3345_v36 = vld [vmem:[%s4166_s10 + $0xd8] sm:$0xff]  }
 0x672   :  { %v1484_v23 = vrot.slane %v1469_v14, %v3599_v41  ;;  %3162 = vmatpush3.bf16.msra.mxu0 %v3343_v62 }
 0x673   :  { %3163 = vmatprep.subr.bf16.mxu0 %v3344_v35 }
 0x674   :  { %v1487_v58 = vadd.f32 %v1484_v23, %v1477_v17  ;;  %v1486_v24 = vadd.f32 %v1484_v23, %v1476_v21  ;;  %v1488_v25 = vadd.f32 %v1484_v23, %v1478_v22  ;;  %v1489_v26 = vadd.f32 %v1484_v23, %v1479_v42 }
 0x676   :  { %v1490_v27 = vmax.f32 %v1486_v24, 0.0  ;;  %v1491_v28 = vmax.f32 %v1487_v58, 0.0  ;;  %v1492_v30 = vmax.f32 %v1488_v25, 0.0  ;;  %v1493_v52 = vmax.f32 %v1489_v26, 0.0  ;;  %3164 = vmatpush3.bf16.msra.mxu0 %v3344_v35 }
 0x677   :  { %3165 = vmatprep.subr.bf16.mxu0 %v3345_v36 }
 0x678   :  { %v1494_v33 = vpack.c.bf16 %v1491_v28, %v1490_v27  ;;  %v1495_v55 = vpack.c.bf16 %v1493_v52, %v1492_v30 }
 0x67a   :  { %3155 = vmatprep.mubr.bf16.mxu1 %v1494_v33  ;;  %3166 = vmatpush3.bf16.msra.mxu0 %v3345_v36  ;;  %v2763_v36 = vld [vmem:[%s4169_s6 + $0x3] sm:$0x1] }
 0x67b   :  { %3156 = vmatmul.mubr.bf16.vlgmr.msra.gmra.mrb[20].mxu1 %v1495_v55  ;;  %3167 = vmatprep.subr.bf16.mxu0 %v3346_v37 }
 0x67e   :  { %3168 = vmatpush3.bf16.msra.mxu0 %v3346_v37 }
 0x67f   :  { %3169 = vmatprep.subr.bf16.mxu0 %v3347_v39 }
 0x682   :  { %3170 = vmatpush3.bf16.msra.mxu0 %v3347_v39 }
 0x683   :  { %3171 = vmatprep.subr.bf16.mxu0 %v3348_v40 }
 0x686   :  { %3172 = vmatpush3.bf16.msra.mxu0 %v3348_v40  ;;  %v2764_v40 = vld [vmem:[%s4170_s7 + $0x3] sm:$0x1] }
 0x687   :  { %3173 = vmatprep.subr.bf16.mxu0 %v3349_v43 }
 0x68a   :  { %3174 = vmatpush3.bf16.msra.mxu0 %v3349_v43 }
 0x74e   :  { %v3157_v0 = vpop.f32.mrb[20].mxu1 }
 0x74f   :  { %v1612_v1 = vadd.f32 %v3157_v0, %v3847_v29  ;;  %v1595_v57 = vpop.f32.mrb[21].mxu1 }
 0x750   :  { %v1610_v63 = vadd.f32 %v1595_v57, %v3849_v31  ;;  %v3158_v60 = vpop.f32.mrb[22].mxu1 }
 0x751   :  { %v1624_v5 = vadd.f32 %v2762_v56, %v1612_v1  ;;  %v1613_v2 = vadd.f32 %v3158_v60, %v3851_v32  ;;  %v1598_v61 = vpop.f32.mrb[23].mxu1 }
 0x752   :  { %v1622_v3 = vadd.f32 %v2762_v56, %v1610_v63  ;;  %v1611_v6 = vadd.f32 %v1598_v61, %v3853_v54 }
 0x753   :  { %v3955_v7 = vadd.f32 %v1656_v59, %v1624_v5  ;;  %v1625_v8 = vadd.f32 %v2762_v56, %v1613_v2 }
 0x754   :  { %v3957_v9 = vadd.f32 %v1652_v4, %v1622_v3  ;;  %v1623_v29 = vadd.f32 %v2762_v56, %v1611_v6  ;;  %v3350_v3 = vld [vmem:[%s4171_s11 + $0xc0] sm:$0xff]   ;;  %v3352_v6 = vld [vmem:[%s4171_s11 + $0xd0] sm:$0xff]  }
 0x755   :  { %v3959_v16 = vadd.f32 %v1656_v59, %v1625_v8  ;;  %v1679_v54 = vmul.f32 %v3955_v7, %v3955_v7  ;;  %3179 = vmatprep.subr.bf16.mxu1 %v3350_v3  ;;  %v3353_v8 = vld [vmem:[%s4171_s11 + $0xd8] sm:$0xff]  }
 0x756   :  { %v3961_v31 = vadd.f32 %v1652_v4, %v1623_v29  ;;  %v1677_v10 = vmul.f32 %v3957_v9, %v3957_v9  ;;  %3180 = vmatpush3.bf16.msra.mxu1 %v3350_v3  ;;  %v3351_v4 = vld [vmem:[%s4171_s11 + $0xc8] sm:$0xff]   ;;  %v3354_v29 = vld [vmem:[%s4171_s11 + $0xe0] sm:$0xff]  }
 0x757   :  { %v1680_v19 = vmul.f32 %v3959_v16, %v3959_v16  ;;  %3181 = vmatprep.subr.bf16.mxu1 %v3351_v4 }
 0x758   :  { %v1667_v32 = vadd.f32 %v3961_v31, %v3957_v9  ;;  %v1678_v11 = vmul.f32 %v3961_v31, %v3961_v31 }
 0x75a   :  { %v1668_v12 = vadd.f32 %v1667_v32, %v3955_v7  ;;  %v1681_v13 = vadd.f32 %v1678_v11, %v1677_v10  ;;  %3182 = vmatpush3.bf16.msra.mxu1 %v3351_v4  ;;  %v3355_v10 = vld [vmem:[%s4171_s11 + $0xe8] sm:$0xff]   ;;  %v3356_v32 = vld [vmem:[%s4171_s11 + $0xf0] sm:$0xff]   ;;  %v3357_v11 = vld [vmem:[%s4171_s11 + $0xf8] sm:$0xff]  }
 0x75b   :  { %3183 = vmatprep.subr.bf16.mxu1 %v3352_v6 }
 0x75c   :  { %v1669_v18 = vadd.f32 %v1668_v12, %v3959_v16  ;;  %v1682_v15 = vadd.f32 %v1681_v13, %v1679_v54 }
 0x75e   :  { %v1670_v14 = vrot.slane %v1669_v18, 4  ;;  %v1683_v17 = vadd.f32 %v1682_v15, %v1680_v19  ;;  %3184 = vmatpush3.bf16.msra.mxu1 %v3352_v6 }
 0x75f   :  { %3185 = vmatprep.subr.bf16.mxu1 %v3353_v8 }
 0x760   :  { %v1671_v21 = vadd.f32 %v1670_v14, %v1669_v18  ;;  %v1684_v22 = vrot.slane %v1683_v17, 4 }
 0x762   :  { %v1672_v42 = vrot.slane %v1671_v21, 2  ;;  %v1685_v23 = vadd.f32 %v1684_v22, %v1683_v17  ;;  %3186 = vmatpush3.bf16.msra.mxu1 %v3353_v8 }
 0x763   :  { %3187 = vmatprep.subr.bf16.mxu1 %v3354_v29 }
 0x764   :  { %v1673_v58 = vadd.f32 %v1672_v42, %v1671_v21  ;;  %v1686_v24 = vrot.slane %v1685_v23, 2 }
 0x766   :  { %v1674_v25 = vrot.slane %v1673_v58, 1  ;;  %v1687_v26 = vadd.f32 %v1686_v24, %v1685_v23  ;;  %3188 = vmatpush3.bf16.msra.mxu1 %v3354_v29 }
 0x767   :  { %3189 = vmatprep.subr.bf16.mxu1 %v3355_v10 }
 0x768   :  { %v1688_v27 = vrot.slane %v1687_v26, 1  ;;  %v1675_v28 = vadd.f32 %v1674_v25, %v1673_v58 }
 0x76a   :  { %v1689_v30 = vadd.f32 %v1688_v27, %v1687_v26  ;;  %v1676_v52 = vmul.f32 0.03125, %v1675_v28  ;;  %3190 = vmatpush3.bf16.msra.mxu1 %v3355_v10 }
 0x76b   :  { %3191 = vmatprep.subr.bf16.mxu1 %v3356_v32 }
 0x76c   :  { %v1690_v33 = vmul.f32 0.03125, %v1689_v30  ;;  %v1691_v55 = vmul.f32 %v1676_v52, %v1676_v52 }
 0x76e   :  { %v1692_v34 = vsub.f32 %v1690_v33, %v1691_v55  ;;  %3192 = vmatpush3.bf16.msra.mxu1 %v3356_v32 }
 0x76f   :  { %3193 = vmatprep.subr.bf16.mxu1 %v3357_v11 }
 0x770   :  { %v1693_v62 = vmax.f32 %v1692_v34, 0.0 }
 0x772   :  { %v1694_v35 = vadd.f32 1e-05, %v1693_v62  ;;  %3194 = vmatpush3.bf16.msra.mxu1 %v3357_v11  ;;  %v3358_v11 = vld [vmem:[%s4166_s10 + $0x100] sm:$0xff]  }
 0x773   :  { %3199 = vmatprep.subr.bf16.mxu0 %v3358_v11 }
 0x774   :  { %3394 = vrsqrt.f32 %v1694_v35 }
 0x77e   :  { %v3395_v37 = vpop.eup %3394 }
 0x77f   :  { %v1696_v39 = vmul.f32 %v3395_v37, %v2763_v36 }
 0x781   :  { %v1697_v43 = vmul.f32 %v1696_v39, %v1676_v52  ;;  %v1703_v44 = vrot.slane %v1696_v39, %v3599_v41 }
 0x783   :  { %v1698_v46 = vsub.f32 %v2764_v40, %v1697_v43  ;;  %v1705_v47 = vmul.f32 %v1703_v44, %v3957_v9  ;;  %v1706_v49 = vmul.f32 %v1703_v44, %v3961_v31  ;;  %v1707_v51 = vmul.f32 %v1703_v44, %v3955_v7 }
 0x784   :  { %v1708_v53 = vmul.f32 %v1703_v44, %v3959_v16 }
 0x785   :  { %v1713_v50 = vrot.slane %v1698_v46, %v3599_v41 }
 0x787   :  { %v1715_v0 = vadd.f32 %v1713_v50, %v1705_v47  ;;  %v1716_v56 = vadd.f32 %v1713_v50, %v1706_v49  ;;  %v1717_v1 = vadd.f32 %v1713_v50, %v1707_v51  ;;  %v1718_v57 = vadd.f32 %v1713_v50, %v1708_v53  ;;  %v2789_v47 = vld [vmem:[%s4172_s8 + $0x3] sm:$0x1] }
 0x788   :  { %v2790_v51 = vld [vmem:[%s4173_s9 + $0x3] sm:$0x1] }
 0x789   :  { %v1719_v63 = vmax.f32 %v1715_v0, 0.0  ;;  %v1720_v60 = vmax.f32 %v1716_v56, 0.0  ;;  %v1721_v5 = vmax.f32 %v1717_v1, 0.0  ;;  %v1722_v59 = vmax.f32 %v1718_v57, 0.0 }
 0x78b   :  { %v1723_v2 = vpack.c.bf16 %v1720_v60, %v1719_v63  ;;  %v1724_v61 = vpack.c.bf16 %v1722_v59, %v1721_v5 }
 0x78d   :  { %3175 = vmatprep.mubr.bf16.mxu0 %v1723_v2 }
 0x78e   :  { %3176 = vmatmul.mubr.bf16.vlgmr.msra.gmra.mrb[16].mxu0 %v1724_v61 }
 0x78f   :  { %3200 = vmatpush3.bf16.msra.mxu0 %v3358_v11 }
 0x861   :  { %v3177_v54 = vpop.f32.mrb[16].mxu0 }
 0x862   :  { %v1824_v12 = vpop.f32.mrb[17].mxu0  ;;  %v1855_v17 = vmul.f32 %v3177_v54, %v3177_v54 }
 0x863   :  { %v3178_v13 = vpop.f32.mrb[18].mxu0  ;;  %v1853_v18 = vmul.f32 %v1824_v12, %v1824_v12 }
 0x864   :  { %v1827_v19 = vpop.f32.mrb[19].mxu0  ;;  %v1856_v42 = vmul.f32 %v3178_v13, %v3178_v13 }
 0x865   :  { %v1843_v15 = vadd.f32 %v1827_v19, %v1824_v12  ;;  %v1854_v14 = vmul.f32 %v1827_v19, %v1827_v19 }
 0x867   :  { %v1844_v21 = vadd.f32 %v3177_v54, %v1843_v15  ;;  %v1857_v22 = vadd.f32 %v1854_v14, %v1853_v18  ;;  %v3363_v18 = vld [vmem:[%s4166_s10 + $0x128] sm:$0xff]   ;;  %v3364_v15 = vld [vmem:[%s4166_s10 + $0x130] sm:$0xff]   ;;  %v3365_v14 = vld [vmem:[%s4166_s10 + $0x138] sm:$0xff]  }
 0x869   :  { %v1845_v23 = vadd.f32 %v3178_v13, %v1844_v21  ;;  %v1858_v58 = vadd.f32 %v1857_v22, %v1855_v17  ;;  %v181_v17 = vsub.s32 4, %v3596_v38 }
 0x86b   :  { %v1846_v24 = vrot.slane %v1845_v23, 4  ;;  %v1859_v25 = vadd.f32 %v1858_v58, %v1856_v42  ;;  %v182_v21 = vrot.slane %v3939_v48, %v181_v17 }
 0x86d   :  { %v1847_v26 = vadd.f32 %v1846_v24, %v1845_v23  ;;  %v1860_v27 = vrot.slane %v1859_v25, 4  ;;  %v413_v22 = vadd.f32 %v3703_v20, %v182_v21 }
 0x86f   :  { %v1848_v28 = vrot.slane %v1847_v26, 2  ;;  %v1861_v30 = vadd.f32 %v1860_v27, %v1859_v25  ;;  %v2038_v42 = vrot.slane %v413_v22, %v3609_v45 }
 0x871   :  { %v1849_v52 = vadd.f32 %v1848_v28, %v1847_v26  ;;  %v1862_v33 = vrot.slane %v1861_v30, 2  ;;  %v2039_v23 = vcombine.high %v2038_v42, %v2038_v42  ;;  %v2046_v24 = vrot.slane %v2038_v42, %v3609_v45  ;;  %v2816_v26 = vld [vmem:[%s4174_s12 + $0x3] ss:$0 sm:$0xff] }
 0x873   :  { %v1850_v55 = vrot.slane %v1849_v52, 1  ;;  %v1863_v34 = vadd.f32 %v1862_v33, %v1861_v30  ;;  %v2053_v58 = vrot.slane %v2039_v23, %v3609_v45  ;;  %v2057_v45 = vrot.slane %v2046_v24, %v3599_v41 }
 0x875   :  { %v1851_v62 = vadd.f32 %v1850_v55, %v1849_v52  ;;  %v1864_v35 = vrot.slane %v1863_v34, 1  ;;  %v2061_v20 = vrot.slane %v2053_v58, %v3599_v41 }
 0x877   :  { %v1852_v36 = vmul.f32 0.03125, %v1851_v62  ;;  %v1865_v37 = vadd.f32 %v1864_v35, %v1863_v34 }
 0x879   :  { %v1866_v39 = vmul.f32 0.03125, %v1865_v37  ;;  %v1867_v40 = vmul.f32 %v1852_v36, %v1852_v36 }
 0x87b   :  { %v1868_v43 = vsub.f32 %v1866_v39, %v1867_v40 }
 0x87d   :  { %v1869_v44 = vmax.f32 %v1868_v43, 0.0 }
 0x87f   :  { %v1870_v46 = vadd.f32 1e-05, %v1869_v44 }
 0x881   :  { %3396 = vrsqrt.f32 %v1870_v46 }
 0x88b   :  { %v3397_v49 = vpop.eup %3396 }
 0x88c   :  { %v1872_v50 = vmul.f32 %v3397_v49, %v2789_v47 }
 0x88e   :  { %v1873_v53 = vmul.f32 %v1872_v50, %v1852_v36  ;;  %v1879_v0 = vrot.slane %v1872_v50, %v3599_v41 }
 0x890   :  { %v1874_v56 = vsub.f32 %v2790_v51, %v1873_v53  ;;  %v1882_v1 = vmul.f32 %v1879_v0, %v1827_v19  ;;  %v1881_v57 = vmul.f32 %v1879_v0, %v1824_v12  ;;  %v1883_v63 = vmul.f32 %v3177_v54, %v1879_v0  ;;  %v3359_v54 = vld [vmem:[%s4166_s10 + $0x108] sm:$0xff]   ;;  %v3360_v12 = vld [vmem:[%s4166_s10 + $0x110] sm:$0xff]   ;;  %v3362_v19 = vld [vmem:[%s4166_s10 + $0x120] sm:$0xff]  }
 0x891   :  { %v1884_v60 = vmul.f32 %v3178_v13, %v1879_v0  ;;  %3201 = vmatprep.subr.bf16.mxu0 %v3359_v54  ;;  %v3361_v13 = vld [vmem:[%s4166_s10 + $0x118] sm:$0xff]  }
 0x892   :  { %v1889_v5 = vrot.slane %v1874_v56, %v3599_v41  ;;  %3202 = vmatpush3.bf16.msra.mxu0 %v3359_v54 }
 0x893   :  { %3203 = vmatprep.subr.bf16.mxu0 %v3360_v12 }
 0x894   :  { %v1892_v59 = vadd.f32 %v1889_v5, %v1882_v1  ;;  %v1891_v2 = vadd.f32 %v1889_v5, %v1881_v57  ;;  %v1893_v61 = vadd.f32 %v1889_v5, %v1883_v63  ;;  %v1894_v3 = vadd.f32 %v1889_v5, %v1884_v60 }
 0x896   :  { %v1895_v4 = vmax.f32 %v1891_v2, 0.0  ;;  %v1896_v6 = vmax.f32 %v1892_v59, 0.0  ;;  %v1897_v8 = vmax.f32 %v1893_v61, 0.0  ;;  %v1898_v29 = vmax.f32 %v1894_v3, 0.0  ;;  %3204 = vmatpush3.bf16.msra.mxu0 %v3360_v12  ;;  %v2818_v12 = vld [vmem:[%s4170_s7 + $0x4] sm:$0x1] }
 0x897   :  { %3205 = vmatprep.subr.bf16.mxu0 %v3361_v13 }
 0x898   :  { %v1899_v10 = vpack.c.bf16 %v1896_v6, %v1895_v4  ;;  %v1900_v32 = vpack.c.bf16 %v1898_v29, %v1897_v8 }
 0x89a   :  { %3195 = vmatprep.mubr.bf16.mxu1 %v1899_v10  ;;  %3206 = vmatpush3.bf16.msra.mxu0 %v3361_v13 }
 0x89b   :  { %3196 = vmatmul.mubr.bf16.vlgmr.msra.gmra.mrb[24].mxu1 %v1900_v32  ;;  %3207 = vmatprep.subr.bf16.mxu0 %v3362_v19  ;;  %v2817_v32 = vld [vmem:[%s4169_s6 + $0x4] sm:$0x1] }
 0x89e   :  { %3208 = vmatpush3.bf16.msra.mxu0 %v3362_v19 }
 0x89f   :  { %3209 = vmatprep.subr.bf16.mxu0 %v3363_v18 }
 0x8a2   :  { %3210 = vmatpush3.bf16.msra.mxu0 %v3363_v18 }
 0x8a3   :  { %3211 = vmatprep.subr.bf16.mxu0 %v3364_v15 }
 0x8a6   :  { %3212 = vmatpush3.bf16.msra.mxu0 %v3364_v15 }
 0x8a7   :  { %3213 = vmatprep.subr.bf16.mxu0 %v3365_v14 }
 0x8aa   :  { %3214 = vmatpush3.bf16.msra.mxu0 %v3365_v14 }
 0x96e   :  { %v3197_v25 = vpop.f32.mrb[24].mxu1 }
 0x96f   :  { %v2017_v27 = vadd.f32 %v3197_v25, %v3955_v7  ;;  %v2000_v28 = vpop.f32.mrb[25].mxu1 }
 0x970   :  { %v2015_v38 = vadd.f32 %v2000_v28, %v3957_v9  ;;  %v3198_v48 = vpop.f32.mrb[26].mxu1 }
 0x971   :  { %v2029_v30 = vadd.f32 %v2816_v26, %v2017_v27  ;;  %v2018_v52 = vadd.f32 %v3198_v48, %v3959_v16  ;;  %v2003_v33 = vpop.f32.mrb[27].mxu1 }
 0x972   :  { %v2027_v55 = vadd.f32 %v2816_v26, %v2015_v38  ;;  %v2016_v34 = vadd.f32 %v2003_v33, %v3961_v31  ;;  %v3369_v33 = vld [vmem:[%s4171_s11 + $0x118] sm:$0xff]  }
 0x973   :  { %v4058_v62 = vadd.f32 %v2061_v20, %v2029_v30  ;;  %v2030_v35 = vadd.f32 %v2816_v26, %v2018_v52  ;;  %v3366_v30 = vld [vmem:[%s4171_s11 + $0x100] sm:$0xff]   ;;  %v3368_v52 = vld [vmem:[%s4171_s11 + $0x110] sm:$0xff]  }
 0x974   :  { %v4060_v36 = vadd.f32 %v2057_v45, %v2027_v55  ;;  %v2028_v7 = vadd.f32 %v2816_v26, %v2016_v34  ;;  %3219 = vmatprep.subr.bf16.mxu1 %v3366_v30  ;;  %v3370_v55 = vld [vmem:[%s4171_s11 + $0x120] sm:$0xff]   ;;  %v3372_v34 = vld [vmem:[%s4171_s11 + $0x130] sm:$0xff]  }
 0x975   :  { %v4062_v37 = vadd.f32 %v2061_v20, %v2030_v35  ;;  %v2084_v31 = vmul.f32 %v4058_v62, %v4058_v62  ;;  %3220 = vmatpush3.bf16.msra.mxu1 %v3366_v30  ;;  %v3367_v20 = vld [vmem:[%s4171_s11 + $0x108] sm:$0xff]   ;;  %v3373_v35 = vld [vmem:[%s4171_s11 + $0x138] sm:$0xff]  }
 0x976   :  { %v4064_v9 = vadd.f32 %v2057_v45, %v2028_v7  ;;  %v2082_v39 = vmul.f32 %v4060_v36, %v4060_v36  ;;  %3221 = vmatprep.subr.bf16.mxu1 %v3367_v20  ;;  %v3371_v45 = vld [vmem:[%s4171_s11 + $0x128] sm:$0xff]   ;;  %v3374_v7 = vld [vmem:[%s4175_s13] sm:$0xff]  }
 0x977   :  { %v2085_v46 = vmul.f32 %v4062_v37, %v4062_v37  ;;  %3239 = vmatprep.subr.bf16.mxu0 %v3374_v7 }
 0x978   :  { %v2072_v16 = vadd.f32 %v4064_v9, %v4060_v36  ;;  %v2083_v40 = vmul.f32 %v4064_v9, %v4064_v9 }
 0x979   :  { %3222 = vmatpush3.bf16.msra.mxu1 %v3367_v20 }
 0x97a   :  { %v2073_v43 = vadd.f32 %v2072_v16, %v4058_v62  ;;  %v2086_v44 = vadd.f32 %v2083_v40, %v2082_v39  ;;  %3223 = vmatprep.subr.bf16.mxu1 %v3368_v52  ;;  %v3375_v39 = vld [vmem:[%s4175_s13 + $0x8] sm:$0xff]   ;;  %v3376_v16 = vld [vmem:[%s4175_s13 + $0x10] sm:$0xff]   ;;  %v3377_v40 = vld [vmem:[%s4175_s13 + $0x18] sm:$0xff]  }
 0x97c   :  { %v2074_v47 = vadd.f32 %v2073_v43, %v4062_v37  ;;  %v2087_v49 = vadd.f32 %v2086_v44, %v2084_v31  ;;  %v3378_v31 = vld [vmem:[%s4175_s13 + $0x20] sm:$0xff]  }
 0x97d   :  { %3224 = vmatpush3.bf16.msra.mxu1 %v3368_v52 }
 0x97e   :  { %v2075_v50 = vrot.slane %v2074_v47, 4  ;;  %v2088_v51 = vadd.f32 %v2087_v49, %v2085_v46  ;;  %3225 = vmatprep.subr.bf16.mxu1 %v3369_v33 }
 0x980   :  { %v2076_v53 = vadd.f32 %v2075_v50, %v2074_v47  ;;  %v2089_v0 = vrot.slane %v2088_v51, 4 }
 0x981   :  { %3226 = vmatpush3.bf16.msra.mxu1 %v3369_v33 }
 0x982   :  { %v2077_v56 = vrot.slane %v2076_v53, 2  ;;  %v2090_v1 = vadd.f32 %v2089_v0, %v2088_v51  ;;  %3227 = vmatprep.subr.bf16.mxu1 %v3370_v55 }
 0x984   :  { %v2078_v57 = vadd.f32 %v2077_v56, %v2076_v53  ;;  %v2091_v63 = vrot.slane %v2090_v1, 2 }
 0x985   :  { %3228 = vmatpush3.bf16.msra.mxu1 %v3370_v55 }
 0x986   :  { %v2079_v60 = vrot.slane %v2078_v57, 1  ;;  %v2092_v5 = vadd.f32 %v2091_v63, %v2090_v1  ;;  %3229 = vmatprep.subr.bf16.mxu1 %v3371_v45 }
 0x988   :  { %v2093_v59 = vrot.slane %v2092_v5, 1  ;;  %v2080_v2 = vadd.f32 %v2079_v60, %v2078_v57 }
 0x989   :  { %3230 = vmatpush3.bf16.msra.mxu1 %v3371_v45 }
 0x98a   :  { %v2094_v61 = vadd.f32 %v2093_v59, %v2092_v5  ;;  %v2081_v3 = vmul.f32 0.03125, %v2080_v2  ;;  %3231 = vmatprep.subr.bf16.mxu1 %v3372_v34 }
 0x98c   :  { %v2095_v4 = vmul.f32 0.03125, %v2094_v61  ;;  %v2096_v6 = vmul.f32 %v2081_v3, %v2081_v3 }
 0x98d   :  { %3232 = vmatpush3.bf16.msra.mxu1 %v3372_v34 }
 0x98e   :  { %v2097_v8 = vsub.f32 %v2095_v4, %v2096_v6  ;;  %3233 = vmatprep.subr.bf16.mxu1 %v3373_v35 }
 0x990   :  { %v2098_v29 = vmax.f32 %v2097_v8, 0.0 }
 0x991   :  { %3234 = vmatpush3.bf16.msra.mxu1 %v3373_v35 }
 0x992   :  { %v2099_v10 = vadd.f32 1e-05, %v2098_v29 }
 0x994   :  { %3398 = vrsqrt.f32 %v2099_v10 }
 0x99e   :  { %v3399_v11 = vpop.eup %3398 }
 0x99f   :  { %v2101_v54 = vmul.f32 %v3399_v11, %v2817_v32 }
 0x9a1   :  { %v2102_v13 = vmul.f32 %v2101_v54, %v2081_v3  ;;  %v2108_v19 = vrot.slane %v2101_v54, %v3599_v41 }
 0x9a3   :  { %v2103_v18 = vsub.f32 %v2818_v12, %v2102_v13  ;;  %v2110_v15 = vmul.f32 %v2108_v19, %v4060_v36  ;;  %v2111_v14 = vmul.f32 %v2108_v19, %v4064_v9  ;;  %v2112_v21 = vmul.f32 %v2108_v19, %v4058_v62 }
 0x9a4   :  { %v2113_v22 = vmul.f32 %v2108_v19, %v4062_v37 }
 0x9a5   :  { %v2118_v17 = vrot.slane %v2103_v18, %v3599_v41 }
 0x9a7   :  { %v2120_v42 = vadd.f32 %v2118_v17, %v2110_v15  ;;  %v2121_v23 = vadd.f32 %v2118_v17, %v2111_v14  ;;  %v2122_v58 = vadd.f32 %v2118_v17, %v2112_v21  ;;  %v2123_v24 = vadd.f32 %v2118_v17, %v2113_v22  ;;  %v2843_v14 = vld [vmem:[%s4172_s8 + $0x4] sm:$0x1] }
 0x9a8   :  { %v2844_v22 = vld [vmem:[%s4173_s9 + $0x4] sm:$0x1] }
 0x9a9   :  { %v2124_v25 = vmax.f32 %v2120_v42, 0.0  ;;  %v2125_v26 = vmax.f32 %v2121_v23, 0.0  ;;  %v2126_v27 = vmax.f32 %v2122_v58, 0.0  ;;  %v2127_v28 = vmax.f32 %v2123_v24, 0.0 }
 0x9ab   :  { %v2128_v38 = vpack.c.bf16 %v2125_v26, %v2124_v25  ;;  %v2129_v48 = vpack.c.bf16 %v2127_v28, %v2126_v27 }
 0x9ad   :  { %3215 = vmatprep.mubr.bf16.mxu0 %v2128_v38 }
 0x9ae   :  { %3216 = vmatmul.mubr.bf16.vlgmr.msra.gmra.mrb[20].mxu0 %v2129_v48 }
 0x9af   :  { %3240 = vmatpush3.bf16.msra.mxu0 %v3374_v7  ;;  %v3379_v7 = vld [vmem:[%s4175_s13 + $0x28] sm:$0xff]  }
 0x9b0   :  { %3241 = vmatprep.subr.bf16.mxu0 %v3375_v39 }
 0x9b3   :  { %3242 = vmatpush3.bf16.msra.mxu0 %v3375_v39  ;;  %v3381_v39 = vld [vmem:[%s4175_s13 + $0x38] sm:$0xff]  }
 0x9b4   :  { %3243 = vmatprep.subr.bf16.mxu0 %v3376_v16 }
 0x9b7   :  { %3244 = vmatpush3.bf16.msra.mxu0 %v3376_v16 }
 0x9b8   :  { %3245 = vmatprep.subr.bf16.mxu0 %v3377_v40 }
 0x9bb   :  { %3246 = vmatpush3.bf16.msra.mxu0 %v3377_v40  ;;  %v2870_v40 = vld [vmem:[%s4174_s12 + $0x4] ss:$0 sm:$0xff] }
 0x9bc   :  { %3247 = vmatprep.subr.bf16.mxu0 %v3378_v31 }
 0x9bf   :  { %3248 = vmatpush3.bf16.msra.mxu0 %v3378_v31 }
 0x9c0   :  { %3249 = vmatprep.subr.bf16.mxu0 %v3379_v7 }
 0x9c3   :  { %3250 = vmatpush3.bf16.msra.mxu0 %v3379_v7 }
 0xa81   :  { %v3217_v43 = vpop.f32.mrb[20].mxu0 }
 0xa82   :  { %v2229_v44 = vpop.f32.mrb[21].mxu0  ;;  %v2260_v53 = vmul.f32 %v3217_v43, %v3217_v43 }
 0xa83   :  { %v3218_v46 = vpop.f32.mrb[22].mxu0  ;;  %v2258_v49 = vmul.f32 %v2229_v44, %v2229_v44 }
 0xa84   :  { %v2232_v47 = vpop.f32.mrb[23].mxu0  ;;  %v2261_v1 = vmul.f32 %v3218_v46, %v3218_v46 }
 0xa85   :  { %v2248_v50 = vadd.f32 %v2232_v47, %v2229_v44  ;;  %v2259_v51 = vmul.f32 %v2232_v47, %v2232_v47 }
 0xa87   :  { %v2249_v0 = vadd.f32 %v3217_v43, %v2248_v50  ;;  %v2262_v56 = vadd.f32 %v2259_v51, %v2258_v49 }
 0xa89   :  { %v2250_v57 = vadd.f32 %v3218_v46, %v2249_v0  ;;  %v2263_v63 = vadd.f32 %v2262_v56, %v2260_v53 }
 0xa8b   :  { %v2251_v60 = vrot.slane %v2250_v57, 4  ;;  %v2264_v5 = vadd.f32 %v2263_v63, %v2261_v1 }
 0xa8d   :  { %v2252_v59 = vadd.f32 %v2251_v60, %v2250_v57  ;;  %v2265_v2 = vrot.slane %v2264_v5, 4 }
 0xa8f   :  { %v2253_v61 = vrot.slane %v2252_v59, 2  ;;  %v2266_v3 = vadd.f32 %v2265_v2, %v2264_v5 }
 0xa91   :  { %v2254_v4 = vadd.f32 %v2253_v61, %v2252_v59  ;;  %v2267_v6 = vrot.slane %v2266_v3, 2 }
 0xa93   :  { %v2255_v8 = vrot.slane %v2254_v4, 1  ;;  %v2268_v29 = vadd.f32 %v2267_v6, %v2266_v3 }
 0xa95   :  { %v2256_v10 = vadd.f32 %v2255_v8, %v2254_v4  ;;  %v2269_v32 = vrot.slane %v2268_v29, 1 }
 0xa97   :  { %v2257_v11 = vmul.f32 0.03125, %v2256_v10  ;;  %v2270_v54 = vadd.f32 %v2269_v32, %v2268_v29 }
 0xa99   :  { %v2271_v12 = vmul.f32 0.03125, %v2270_v54  ;;  %v2272_v13 = vmul.f32 %v2257_v11, %v2257_v11 }
 0xa9b   :  { %v2273_v19 = vsub.f32 %v2271_v12, %v2272_v13 }
 0xa9d   :  { %v2274_v18 = vmax.f32 %v2273_v19, 0.0 }
 0xa9f   :  { %v2275_v15 = vadd.f32 1e-05, %v2274_v18 }
 0xaa1   :  { %3400 = vrsqrt.f32 %v2275_v15 }
 0xaab   :  { %v3401_v17 = vpop.eup %3400 }
 0xaac   :  { %v2277_v21 = vmul.f32 %v3401_v17, %v2843_v14 }
 0xaae   :  { %v2278_v42 = vmul.f32 %v2277_v21, %v2257_v11  ;;  %v2284_v23 = vrot.slane %v2277_v21, %v3599_v41 }
 0xab0   :  { %v2279_v58 = vsub.f32 %v2844_v22, %v2278_v42  ;;  %v2287_v24 = vmul.f32 %v2284_v23, %v2232_v47  ;;  %v2286_v25 = vmul.f32 %v2284_v23, %v2229_v44  ;;  %v2288_v26 = vmul.f32 %v3217_v43, %v2284_v23 }
 0xab1   :  { %v2289_v27 = vmul.f32 %v3218_v46, %v2284_v23 }
 0xab2   :  { %v2294_v28 = vrot.slane %v2279_v58, %v3599_v41  ;;  %v3380_v41 = vld [vmem:[%s4175_s13 + $0x30] sm:$0xff]  }
 0xab3   :  { %3251 = vmatprep.subr.bf16.mxu0 %v3380_v41 }
 0xab4   :  { %v2297_v38 = vadd.f32 %v2294_v28, %v2287_v24  ;;  %v2296_v48 = vadd.f32 %v2294_v28, %v2286_v25  ;;  %v2298_v30 = vadd.f32 %v2294_v28, %v2288_v26  ;;  %v2299_v20 = vadd.f32 %v2294_v28, %v2289_v27  ;;  %3252 = vmatpush3.bf16.msra.mxu0 %v3380_v41 }
 0xab5   :  { %3253 = vmatprep.subr.bf16.mxu0 %v3381_v39 }
 0xab6   :  { %v2300_v52 = vmax.f32 %v2296_v48, 0.0  ;;  %v2301_v33 = vmax.f32 %v2297_v38, 0.0  ;;  %v2302_v55 = vmax.f32 %v2298_v30, 0.0  ;;  %v2303_v45 = vmax.f32 %v2299_v20, 0.0 }
 0xab8   :  { %v2304_v34 = vpack.c.bf16 %v2301_v33, %v2300_v52  ;;  %v2305_v35 = vpack.c.bf16 %v2303_v45, %v2302_v55  ;;  %3254 = vmatpush3.bf16.msra.mxu0 %v3381_v39 }
 0xaba   :  { %3235 = vmatprep.mubr.bf16.mxu1 %v2304_v34 }
 0xabb   :  { %3236 = vmatmul.mubr.bf16.vlgmr.msra.gmra.mrb[28].mxu1 %v2305_v35 }
 0xb8e   :  { %v3237_v16 = vpop.f32.mrb[28].mxu1 }
 0xb8f   :  { %v2422_v31 = vadd.f32 %v3237_v16, %v4058_v62  ;;  %v2405_v43 = vpop.f32.mrb[29].mxu1  ;;  %v2871_v62 = vld [vmem:[%s4176_s14] ss:$0 sm:$0xff] }
 0xb90   :  { %v2420_v44 = vadd.f32 %v2405_v43, %v4060_v36  ;;  %v3238_v46 = vpop.f32.mrb[30].mxu1 }
 0xb91   :  { %v2434_v47 = vadd.f32 %v2870_v40, %v2422_v31  ;;  %v2423_v49 = vadd.f32 %v3238_v46, %v4062_v37  ;;  %v2408_v50 = vpop.f32.mrb[31].mxu1 }
 0xb92   :  { %v2432_v51 = vadd.f32 %v2870_v40, %v2420_v44  ;;  %v2421_v53 = vadd.f32 %v2408_v50, %v4064_v9 }
 0xb93   :  { %v2435_v0 = vadd.f32 %v2870_v40, %v2423_v49  ;;  %v2438_v1 = vmax.f32 %v2434_v47, 0.0 }
 0xb94   :  { %v2433_v56 = vadd.f32 %v2870_v40, %v2421_v53  ;;  %v2436_v63 = vmax.f32 %v2432_v51, 0.0 }
 0xb95   :  { %v2439_v57 = vmax.f32 %v2435_v0, 0.0 }
 0xb96   :  { %v2437_v60 = vmax.f32 %v2433_v56, 0.0 }
 0xb97   :  { %v2441_v5 = vpack.c.bf16 %v2439_v57, %v2438_v1 }
 0xb98   :  { %v2440_v59 = vpack.c.bf16 %v2437_v60, %v2436_v63 }
 0xb9a   :  { %3255 = vmatprep.mubr.bf16.mxu0 %v2440_v59 }
 0xb9b   :  { %3256 = vmatmul.mubr.bf16.vlgmr.msra.gmra.mrb[24].mxu0 %v2441_v5 }
 0xc6e   :  { %v3257_v36 = vpop.f32.mrb[24].mxu0 }
 0xc6f   :  { %v2556_v37 = vadd.f32 %v3257_v36, %v2871_v62  ;;  %v2547_v2 = vpop.f32.mrb[25].mxu0 }
 0xc70   :  { %v2548_v61 = vadd.f32 %v2871_v62, %v2547_v2  ;;  %v3258_v3 = vpop.f32.mrb[26].mxu0 }
 0xc71   :  { %v2882_v9 = vmul.f32 -1.442695, %v2556_v37  ;;  %v2559_v4 = vadd.f32 %v3258_v3, %v2871_v62  ;;  %v2550_v6 = vpop.f32.mrb[27].mxu0 }
 0xc72   :  { %v2880_v8 = vmul.f32 -1.442695, %v2548_v61  ;;  %v2551_v29 = vadd.f32 %v2871_v62, %v2550_v6 }
 0xc73   :  { %3402 = vpow2.f32 %v2882_v9  ;;  %v2883_v10 = vmul.f32 -1.442695, %v2559_v4 }
 0xc74   :  { %3404 = vpow2.f32 %v2880_v8  ;;  %v2881_v32 = vmul.f32 -1.442695, %v2551_v29 }
 0xc75   :  { %3406 = vpow2.f32 %v2883_v10 }
 0xc76   :  { %3408 = vpow2.f32 %v2881_v32 }
 0xc7d   :  { %v3403_v11 = vpop.eup %3402 }
 0xc7e   :  { %v3405_v54 = vpop.eup %3404  ;;  %v2576_v12 = vadd.f32 1.0, %v3403_v11 }
 0xc7f   :  { %v3407_v13 = vpop.eup %3406  ;;  %v2574_v19 = vadd.f32 1.0, %v3405_v54 }
 0xc80   :  { %v3409_v18 = vpop.eup %3408  ;;  %3410 = vrcp.f32 %v2576_v12  ;;  %v2577_v15 = vadd.f32 1.0, %v3407_v13 }
 0xc81   :  { %3412 = vrcp.f32 %v2574_v19  ;;  %v2575_v14 = vadd.f32 1.0, %v3409_v18 }
 0xc82   :  { %3414 = vrcp.f32 %v2577_v15 }
 0xc83   :  { %3416 = vrcp.f32 %v2575_v14 }
 0xc8a   :  { %v3411_v17 = vpop.eup %3410 }
 0xc8b   :  { %v3413_v21 = vpop.eup %3412 }
 0xc8c   :  { %v3415_v22 = vpop.eup %3414 }
 0xc8d   :  { %v3417_v42 = vpop.eup %3416  ;;  %v2900_v23 = vpack.c.bf16 %v3415_v22, %v3411_v17 }
 0xc8e   :  { %v2895_v58 = vpack.c.bf16 %v3417_v42, %v3413_v21 }
 0xc8f   :  { %2902 = vst [vmem:[%s4177_s15 + $0x8] sm:$0xff] %v2900_v23  }
 0xc90   :  { %2896 = vst [vmem:[%s4177_s15] sm:$0xff] %v2895_v58  }

</bundles_post_ra>
